<compile_context>
chip_gen: v5e
topology: v5e:2x2
jax: 0.10.0
libtpu: 0.0.40
codegen_flags: <defaults>
</compile_context>

<pallas_src>
import math
from functools import partial

import jax
import jax.numpy as jnp
from jax.experimental import pallas as pl
from jax.experimental.pallas import tpu as pltpu

_EPS = 1e-6


# ----------------------------------------------------------------------------
# Fused Pallas kernel (one grid step = one batch element, everything in VMEM)
# ----------------------------------------------------------------------------
def _layernorm(x, eps=_EPS):
    m = jnp.mean(x, axis=-1, keepdims=True)
    v = jnp.mean(jnp.square(x - m), axis=-1, keepdims=True)
    return (x - m) * jax.lax.rsqrt(v + eps)


def _dit_fused_kernel(xp_ref, mod_ref, fmod_ref, posb_ref, pw_ref, *rest,
                      num_layers, num_heads):
    # rest = [8 refs per layer] + [proj_w, proj_b] + [out]
    layer_refs = rest[:8 * num_layers]
    proj_w = rest[8 * num_layers]
    proj_b = rest[8 * num_layers + 1]
    o_ref = rest[-1]

    N, D = posb_ref.shape
    dh = D // num_heads
    scale = 1.0 / math.sqrt(dh)
    f32 = jnp.float32
    bf16 = jnp.bfloat16

    # ---- patch embedding (+ pos emb + patch bias, pre-summed wrapper-side) ----
    x = jnp.dot(xp_ref[0], pw_ref[...], preferred_element_type=f32)
    x = x + posb_ref[...]                                             # (N, D) f32

    mod = mod_ref[0]                                                  # (L, 6, D) f32
    fmod = fmod_ref[0]                                                # (2, D)    f32

    # ---- transformer layers ----
    for l in range(num_layers):
        (qkv_w, qkv_b, ow, ob, w1, b1, w2, b2) = layer_refs[8 * l:8 * (l + 1)]
        sh_a = mod[l, 0:1, :]
        sc_a = mod[l, 1:2, :]
        g_a = mod[l, 2:3, :]
        sh_m = mod[l, 3:4, :]
        sc_m = mod[l, 4:5, :]
        g_m = mod[l, 5:6, :]

        # --- attention block ---
        h = _layernorm(x) * (1.0 + sc_a) + sh_a                       # (N, D) f32
        qkv = jnp.dot(h.astype(bf16), qkv_w[...],
                      preferred_element_type=f32) + qkv_b[...]        # (N, 3D) f32
        qkvb = qkv.astype(bf16)
        attn = jnp.zeros((N, D), f32)
        for hh in range(num_heads):
            qh = qkvb[:, hh * dh:(hh + 1) * dh]
            kh = qkvb[:, D + hh * dh:D + (hh + 1) * dh]
            vh = qkvb[:, 2 * D + hh * dh:2 * D + (hh + 1) * dh]
            # contract over dh directly -- no materialized kh.T
            s = jax.lax.dot_general(qh, kh, (((1,), (1,)), ((), ())),
                                    preferred_element_type=f32) * scale   # (N, N)
            s = s - jnp.max(s, axis=-1, keepdims=True)
            p = jnp.exp(s)
            p = p * pl.reciprocal(jnp.sum(p, axis=-1, keepdims=True), approx=True)
            ctx = jnp.dot(p.astype(bf16), vh, preferred_element_type=f32)  # (N, dh)
            # accumulate into the out-projection: no lane concatenate
            attn = attn + jnp.dot(ctx.astype(bf16), ow[hh * dh:(hh + 1) * dh, :],
                                  preferred_element_type=f32)
        attn = attn + ob[...]
        x = x + g_a * attn

        # --- MLP block ---
        h = _layernorm(x) * (1.0 + sc_m) + sh_m
        h = jnp.dot(h.astype(bf16), w1[...], preferred_element_type=f32) + b1[...]
        h = jax.nn.gelu(h, approximate=True)       # == nn.GELU(approximate='tanh')
        h = jnp.dot(h.astype(bf16), w2[...], preferred_element_type=f32) + b2[...]
        x = x + g_m * h

    # ---- final adaLN modulate + padded proj_out (lane-dense 128-wide store) ----
    h = _layernorm(x) * (1.0 + fmod[1:2, :]) + fmod[0:1, :]
    out = jnp.dot(h.astype(bf16), proj_w[...], preferred_element_type=f32) + proj_b[...]
    o_ref[...] = out[None].astype(o_ref.dtype)


def _resident_spec(shape):
    """Full-array block kept resident in VMEM, single-buffered (index never changes)."""
    zero = (0,) * len(shape)
    idx = lambda b, _z=zero: _z
    if hasattr(pl, "Buffered"):
        try:
            return pl.BlockSpec(shape, idx, pipeline_mode=pl.Buffered(1))
        except TypeError:
            pass
    return pl.BlockSpec(shape, idx)


# ----------------------------------------------------------------------------
# Plain-JAX glue (embeddings, patchify, hoisted conditioning matvecs)
# ----------------------------------------------------------------------------
def get_time_embedding(time_steps, temb_dim):
    assert temb_dim % 2 == 0
    half = temb_dim // 2
    factor = 10000.0 ** (jnp.arange(half, dtype=jnp.float32) / half)
    t = time_steps.astype(jnp.float32)[:, None] / factor[None, :]
    return jnp.concatenate([jnp.sin(t), jnp.cos(t)], axis=-1)


def get_patch_position_embedding(pos_emb_dim, nh, nw):
    assert pos_emb_dim % 4 == 0
    gh, gw = jnp.meshgrid(jnp.arange(nh, dtype=jnp.float32),
                          jnp.arange(nw, dtype=jnp.float32), indexing="ij")
    h_pos, w_pos = gh.reshape(-1), gw.reshape(-1)
    quarter = pos_emb_dim // 4
    factor = 10000.0 ** (jnp.arange(quarter, dtype=jnp.float32) / quarter)
    h = h_pos[:, None] / factor
    h = jnp.concatenate([jnp.sin(h), jnp.cos(h)], axis=-1)
    w = w_pos[:, None] / factor
    w = jnp.concatenate([jnp.sin(w), jnp.cos(w)], axis=-1)
    return jnp.concatenate([h, w], axis=-1)          # (nh*nw, pos_emb_dim)


def dit_forward(params, x, t, condition=None, *, patch, num_heads, temb_dim):
    # `condition` is accepted (as in the PyTorch forward) but unused.
    B, C, H, W = x.shape
    ph = pw = patch
    nh, nw = H // ph, W // pw
    N = nh * nw
    P = ph * pw * C
    D = params["patch_w"].shape[1]
    L = len(params["layers"])
    P_pad = ((P + 127) // 128) * 128

    f32 = jnp.float32
    bf16 = jnp.bfloat16

    # patchify: 'b c (nh ph) (nw pw) -> b (nh nw) (ph pw c)'   (layout plumbing)
    xp = x.reshape(B, C, nh, ph, nw, pw).transpose(0, 2, 4, 3, 5, 1)
    xp = xp.reshape(B, N, P).astype(bf16)

    # ---- hoisted conditioning math: all M=1 matvecs stay in plain XLA ----
    t_emb = get_time_embedding(t.astype(jnp.int32), temb_dim)            # (B, temb)
    te = t_emb @ params["tproj_w1"].astype(f32) + params["tproj_b1"]
    te = jax.nn.silu(te)
    te = te @ params["tproj_w2"].astype(f32) + params["tproj_b2"]        # (B, D)
    te_s = jax.nn.silu(te)            # every adaLN branch starts with SiLU(t_emb)

    mods = []
    for lp in params["layers"]:
        m = te_s @ lp["ada_w"].astype(f32) + lp["ada_b"]                 # (B, 6D)
        mods.append(m.reshape(B, 6, D))
    mod_layers = jnp.stack(mods, axis=1).astype(f32)                     # (B, L, 6, D)
    fmod = (te_s @ params["ada_w"].astype(f32) + params["ada_b"])
    fmod = fmod.reshape(B, 2, D).astype(f32)                             # (B, 2, D)

    # pos-emb + patch bias folded into one resident (N, D) add
    posb = (params["pos_emb"] + params["patch_b"][None, :]).astype(f32)

    # proj_out padded to a lane-dense (multiple-of-128) output width
    proj_w = jnp.zeros((D, P_pad), f32).at[:, :P].set(params["proj_out_w"]).astype(bf16)
    proj_b = jnp.zeros((1, P_pad), f32).at[:, :P].set(params["proj_out_b"][None, :])

    weights = [posb, params["patch_w"].astype(bf16)]
    for lp in params["layers"]:
        weights += [lp["qkv_w"].astype(bf16), lp["qkv_b"][None, :].astype(f32),
                    lp["attn_out_w"].astype(bf16), lp["attn_out_b"][None, :].astype(f32),
                    lp["mlp_w1"].astype(bf16), lp["mlp_b1"][None, :].astype(f32),
                    lp["mlp_w2"].astype(bf16), lp["mlp_b2"][None, :].astype(f32)]
    weights += [proj_w, proj_b]

    in_specs = [pl.BlockSpec((1, N, P), lambda b: (b, 0, 0)),
                pl.BlockSpec((1, L, 6, D), lambda b: (b, 0, 0, 0)),
                pl.BlockSpec((1, 2, D), lambda b: (b, 0, 0))]
    in_specs += [_resident_spec(w.shape) for w in weights]

    # explicit scoped-VMEM budget: operands + output + headroom
    operands = [xp, mod_layers, fmod] + weights
    total_bytes = sum(int(a.size) * a.dtype.itemsize for a in operands)
    total_bytes += B * N * P_pad * 4
    vmem_limit = int(min(64 * 1024 * 1024, max(32 * 1024 * 1024, 4 * total_bytes)))

    out = pl.pallas_call(
        partial(_dit_fused_kernel, num_layers=L, num_heads=num_heads),
        out_shape=jax.ShapeDtypeStruct((B, N, P_pad), f32),
        grid=(B,),
        in_specs=in_specs,
        out_specs=pl.BlockSpec((1, N, P_pad), lambda b: (b, 0, 0)),
        compiler_params=pltpu.CompilerParams(
            dimension_semantics=("parallel",),
            vmem_limit_bytes=vmem_limit),
    )(xp, mod_layers, fmod, *weights)

    # drop output-lane padding, then un-patchify (wrapper-side layout plumbing)
    out = out[:, :, :P]
    out = out.reshape(B, nh, nw, ph, pw, C).transpose(0, 5, 1, 3, 2, 4)
    return out.reshape(B, C, nh * ph, nw * pw)


# ----------------------------------------------------------------------------
# Parameter setup (synthetic weights)
# ----------------------------------------------------------------------------
def _dense(key, fan_in, fan_out, std=0.02):
    return jax.random.normal(key, (fan_in, fan_out), jnp.float32) * std


def init_params(key, *, im_channels, patch, hidden, temb_dim, num_layers,
                num_heads, nh, nw):
    patch_dim = im_channels * patch * patch
    ff = 4 * hidden
    keys = iter(jax.random.split(key, 8 + 8 * num_layers))
    z = lambda n: jnp.zeros((n,), jnp.float32)
    p = {
        "patch_w": _dense(next(keys), patch_dim, hidden), "patch_b": z(hidden),
        "pos_emb": get_patch_position_embedding(hidden, nh, nw),
        "tproj_w1": _dense(next(keys), temb_dim, hidden), "tproj_b1": z(hidden),
        "tproj_w2": _dense(next(keys), hidden, hidden), "tproj_b2": z(hidden),
        # zero-init in PyTorch __init__; random here for a non-trivial output
        "ada_w": _dense(next(keys), hidden, 2 * hidden), "ada_b": z(2 * hidden),
        "proj_out_w": _dense(next(keys), hidden, patch_dim), "proj_out_b": z(patch_dim),
    }
    layers = []
    for _ in range(num_layers):
        layers.append({
            "ada_w": _dense(next(keys), hidden, 6 * hidden), "ada_b": z(6 * hidden),
            "qkv_w": _dense(next(keys), hidden, 3 * hidden), "qkv_b": z(3 * hidden),
            "attn_out_w": _dense(next(keys), hidden, hidden), "attn_out_b": z(hidden),
            "mlp_w1": _dense(next(keys), hidden, ff), "mlp_b1": z(ff),
            "mlp_w2": _dense(next(keys), ff, hidden), "mlp_b2": z(hidden),
        })
    p["layers"] = layers
    return p


if __name__ == "__main__":
    # small shapes: B=2, C=4, image 16x16, patch 4 -> 16 tokens, hidden 32
    config = dict(num_layers=2, hidden_size=32, num_heads=4, patch_size=4,
                  timestep_emb_dim=32)
    B, C, H, W = 2, 4, 16, 16
    nh = H // config["patch_size"]
    nw = W // config["patch_size"]

    root = jax.random.PRNGKey(0)
    k_params, k_x = jax.random.split(root)
    params = init_params(
        k_params,
        im_channels=C, patch=config["patch_size"], hidden=config["hidden_size"],
        temb_dim=config["timestep_emb_dim"], num_layers=config["num_layers"],
        num_heads=config["num_heads"], nh=nh, nw=nw,
    )

    x = jax.random.normal(k_x, (B, C, H, W), jnp.float32)
    t = jnp.array([3, 17], dtype=jnp.int32)
    condition = None  # unused by the PyTorch forward as well

    fwd = jax.jit(partial(dit_forward,
                          patch=config["patch_size"],
                          num_heads=config["num_heads"],
                          temb_dim=config["timestep_emb_dim"]))
    out = fwd(params, x, t, condition)
    out = jax.block_until_ready(out)
    assert out.shape == (B, C, H, W), out.shape
    assert jnp.all(jnp.isfinite(out))
    print("KERNEL_OK")
</pallas_src>

<mosaic_0001>
module attributes {stable_mosaic.version = 11 : i64} {
  func.func @_dit_fused_kernel(%arg0: i32, %arg1: memref<1x16x64xbf16, #tpu.memory_space<vmem>>, %arg2: memref<1x2x6x32xf32, #tpu.memory_space<vmem>>, %arg3: memref<1x2x32xf32, #tpu.memory_space<vmem>>, %arg4: memref<16x32xf32, #tpu.memory_space<vmem>>, %arg5: memref<64x32xbf16, #tpu.memory_space<vmem>>, %arg6: memref<32x96xbf16, #tpu.memory_space<vmem>>, %arg7: memref<1x96xf32, #tpu.memory_space<vmem>>, %arg8: memref<32x32xbf16, #tpu.memory_space<vmem>>, %arg9: memref<1x32xf32, #tpu.memory_space<vmem>>, %arg10: memref<32x128xbf16, #tpu.memory_space<vmem>>, %arg11: memref<1x128xf32, #tpu.memory_space<vmem>>, %arg12: memref<128x32xbf16, #tpu.memory_space<vmem>>, %arg13: memref<1x32xf32, #tpu.memory_space<vmem>>, %arg14: memref<32x96xbf16, #tpu.memory_space<vmem>>, %arg15: memref<1x96xf32, #tpu.memory_space<vmem>>, %arg16: memref<32x32xbf16, #tpu.memory_space<vmem>>, %arg17: memref<1x32xf32, #tpu.memory_space<vmem>>, %arg18: memref<32x128xbf16, #tpu.memory_space<vmem>>, %arg19: memref<1x128xf32, #tpu.memory_space<vmem>>, %arg20: memref<128x32xbf16, #tpu.memory_space<vmem>>, %arg21: memref<1x32xf32, #tpu.memory_space<vmem>>, %arg22: memref<32x128xbf16, #tpu.memory_space<vmem>>, %arg23: memref<1x128xf32, #tpu.memory_space<vmem>>, %arg24: memref<1x16x128xf32, #tpu.memory_space<vmem>>) attributes {dimension_semantics = [#tpu.dimension_semantics<parallel>], iteration_bounds = array<i64: 2>, scalar_prefetch = 0 : i64, scratch_operands = 0 : i64, tpu.core_type = #tpu.core_type<tc>, window_params = [{transform_indices = @transform_0, window_bounds = array<i64: 1, 16, 64>}, {transform_indices = @transform_1, window_bounds = array<i64: 1, 2, 6, 32>}, {transform_indices = @transform_2, window_bounds = array<i64: 1, 2, 32>}, {pipeline_mode = #tpu.pipeline_mode<synchronous>, transform_indices = @transform_3, window_bounds = array<i64: 16, 32>}, {pipeline_mode = #tpu.pipeline_mode<synchronous>, transform_indices = @transform_4, window_bounds = array<i64: 64, 32>}, {pipeline_mode = #tpu.pipeline_mode<synchronous>, transform_indices = @transform_5, window_bounds = array<i64: 32, 96>}, {pipeline_mode = #tpu.pipeline_mode<synchronous>, transform_indices = @transform_6, window_bounds = array<i64: 1, 96>}, {pipeline_mode = #tpu.pipeline_mode<synchronous>, transform_indices = @transform_7, window_bounds = array<i64: 32, 32>}, {pipeline_mode = #tpu.pipeline_mode<synchronous>, transform_indices = @transform_8, window_bounds = array<i64: 1, 32>}, {pipeline_mode = #tpu.pipeline_mode<synchronous>, transform_indices = @transform_9, window_bounds = array<i64: 32, 128>}, {pipeline_mode = #tpu.pipeline_mode<synchronous>, transform_indices = @transform_10, window_bounds = array<i64: 1, 128>}, {pipeline_mode = #tpu.pipeline_mode<synchronous>, transform_indices = @transform_11, window_bounds = array<i64: 128, 32>}, {pipeline_mode = #tpu.pipeline_mode<synchronous>, transform_indices = @transform_12, window_bounds = array<i64: 1, 32>}, {pipeline_mode = #tpu.pipeline_mode<synchronous>, transform_indices = @transform_13, window_bounds = array<i64: 32, 96>}, {pipeline_mode = #tpu.pipeline_mode<synchronous>, transform_indices = @transform_14, window_bounds = array<i64: 1, 96>}, {pipeline_mode = #tpu.pipeline_mode<synchronous>, transform_indices = @transform_15, window_bounds = array<i64: 32, 32>}, {pipeline_mode = #tpu.pipeline_mode<synchronous>, transform_indices = @transform_16, window_bounds = array<i64: 1, 32>}, {pipeline_mode = #tpu.pipeline_mode<synchronous>, transform_indices = @transform_17, window_bounds = array<i64: 32, 128>}, {pipeline_mode = #tpu.pipeline_mode<synchronous>, transform_indices = @transform_18, window_bounds = array<i64: 1, 128>}, {pipeline_mode = #tpu.pipeline_mode<synchronous>, transform_indices = @transform_19, window_bounds = array<i64: 128, 32>}, {pipeline_mode = #tpu.pipeline_mode<synchronous>, transform_indices = @transform_20, window_bounds = array<i64: 1, 32>}, {pipeline_mode = #tpu.pipeline_mode<synchronous>, transform_indices = @transform_21, window_bounds = array<i64: 32, 128>}, {pipeline_mode = #tpu.pipeline_mode<synchronous>, transform_indices = @transform_22, window_bounds = array<i64: 1, 128>}, {transform_indices = @transform_23, window_bounds = array<i64: 1, 16, 128>}]} {
    %c0 = arith.constant 0 : index
    %c0_0 = arith.constant 0 : index
    %c0_1 = arith.constant 0 : index
    %0 = vector.load %arg1[%c0, %c0_0, %c0_1] : memref<1x16x64xbf16, #tpu.memory_space<vmem>>, vector<1x16x64xbf16>
    %1 = vector.shape_cast %0 : vector<1x16x64xbf16> to vector<16x64xbf16>
    %c0_2 = arith.constant 0 : index
    %c0_3 = arith.constant 0 : index
    %2 = vector.load %arg5[%c0_2, %c0_3] : memref<64x32xbf16, #tpu.memory_space<vmem>>, vector<64x32xbf16>
    %cst = arith.constant dense<0.000000e+00> : vector<16x32xf32>
    %3 = tpu.matmul %1, %2, %cst {dimension_numbers = #tpu.dot_dimension_numbers<[1], [0], [0], [1], [0, 0, 1, 1], [], []>} : vector<16x64xbf16>, vector<64x32xbf16>, vector<16x32xf32> -> vector<16x32xf32>
    %c0_4 = arith.constant 0 : index
    %c0_5 = arith.constant 0 : index
    %4 = vector.load %arg4[%c0_4, %c0_5] : memref<16x32xf32, #tpu.memory_space<vmem>>, vector<16x32xf32>
    %5 = arith.addf %3, %4 : vector<16x32xf32>
    %c0_6 = arith.constant 0 : index
    %c0_7 = arith.constant 0 : index
    %c0_8 = arith.constant 0 : index
    %c0_9 = arith.constant 0 : index
    %6 = vector.load %arg2[%c0_6, %c0_7, %c0_8, %c0_9] : memref<1x2x6x32xf32, #tpu.memory_space<vmem>>, vector<1x2x6x32xf32>
    %7 = vector.shape_cast %6 : vector<1x2x6x32xf32> to vector<2x6x32xf32>
    %c0_10 = arith.constant 0 : index
    %c0_11 = arith.constant 0 : index
    %c0_12 = arith.constant 0 : index
    %8 = vector.load %arg3[%c0_10, %c0_11, %c0_12] : memref<1x2x32xf32, #tpu.memory_space<vmem>>, vector<1x2x32xf32>
    %9 = vector.shape_cast %8 : vector<1x2x32xf32> to vector<2x32xf32>
    %10 = vector.extract_strided_slice %7 {offsets = [0, 0, 0], sizes = [1, 1, 32], strides = [1, 1, 1]} : vector<2x6x32xf32> to vector<1x1x32xf32>
    %11 = vector.shape_cast %10 : vector<1x1x32xf32> to vector<1x32xf32>
    %12 = vector.extract_strided_slice %7 {offsets = [0, 1, 0], sizes = [1, 1, 32], strides = [1, 1, 1]} : vector<2x6x32xf32> to vector<1x1x32xf32>
    %13 = vector.shape_cast %12 : vector<1x1x32xf32> to vector<1x32xf32>
    %14 = vector.extract_strided_slice %7 {offsets = [0, 2, 0], sizes = [1, 1, 32], strides = [1, 1, 1]} : vector<2x6x32xf32> to vector<1x1x32xf32>
    %15 = vector.shape_cast %14 : vector<1x1x32xf32> to vector<1x32xf32>
    %16 = vector.extract_strided_slice %7 {offsets = [0, 3, 0], sizes = [1, 1, 32], strides = [1, 1, 1]} : vector<2x6x32xf32> to vector<1x1x32xf32>
    %17 = vector.shape_cast %16 : vector<1x1x32xf32> to vector<1x32xf32>
    %18 = vector.extract_strided_slice %7 {offsets = [0, 4, 0], sizes = [1, 1, 32], strides = [1, 1, 1]} : vector<2x6x32xf32> to vector<1x1x32xf32>
    %19 = vector.shape_cast %18 : vector<1x1x32xf32> to vector<1x32xf32>
    %20 = vector.extract_strided_slice %7 {offsets = [0, 5, 0], sizes = [1, 1, 32], strides = [1, 1, 1]} : vector<2x6x32xf32> to vector<1x1x32xf32>
    %21 = vector.shape_cast %20 : vector<1x1x32xf32> to vector<1x32xf32>
    %cst_13 = arith.constant dense<0.000000e+00> : vector<16xf32>
    %22 = vector.multi_reduction <add>, %5, %cst_13 [1] : vector<16x32xf32> to vector<16xf32>
    %23 = vector.shape_cast %22 : vector<16xf32> to vector<16x1xf32>
    %cst_14 = arith.constant 3.200000e+01 : f32
    %24 = vector.broadcast %cst_14 : f32 to vector<16x1xf32>
    %25 = arith.divf %23, %24 : vector<16x1xf32>
    %26 = vector.broadcast %25 : vector<16x1xf32> to vector<16x32xf32>
    %27 = arith.subf %5, %26 : vector<16x32xf32>
    %28 = arith.mulf %27, %27 : vector<16x32xf32>
    %cst_15 = arith.constant dense<0.000000e+00> : vector<16xf32>
    %29 = vector.multi_reduction <add>, %28, %cst_15 [1] : vector<16x32xf32> to vector<16xf32>
    %30 = vector.shape_cast %29 : vector<16xf32> to vector<16x1xf32>
    %cst_16 = arith.constant 3.200000e+01 : f32
    %31 = vector.broadcast %cst_16 : f32 to vector<16x1xf32>
    %32 = arith.divf %30, %31 : vector<16x1xf32>
    %33 = vector.broadcast %25 : vector<16x1xf32> to vector<16x32xf32>
    %34 = arith.subf %5, %33 : vector<16x32xf32>
    %cst_17 = arith.constant 9.99999997E-7 : f32
    %35 = vector.broadcast %cst_17 : f32 to vector<16x1xf32>
    %36 = arith.addf %32, %35 : vector<16x1xf32>
    %37 = math.rsqrt %36 : vector<16x1xf32>
    %38 = vector.broadcast %37 : vector<16x1xf32> to vector<16x32xf32>
    %39 = arith.mulf %34, %38 : vector<16x32xf32>
    %cst_18 = arith.constant 1.000000e+00 : f32
    %40 = vector.broadcast %cst_18 : f32 to vector<1x32xf32>
    %41 = arith.addf %40, %13 : vector<1x32xf32>
    %42 = vector.broadcast %41 : vector<1x32xf32> to vector<16x32xf32>
    %43 = arith.mulf %39, %42 : vector<16x32xf32>
    %44 = vector.broadcast %11 : vector<1x32xf32> to vector<16x32xf32>
    %45 = arith.addf %43, %44 : vector<16x32xf32>
    %46 = arith.truncf %45 : vector<16x32xf32> to vector<16x32xbf16>
    %c0_19 = arith.constant 0 : index
    %c0_20 = arith.constant 0 : index
    %47 = vector.load %arg6[%c0_19, %c0_20] : memref<32x96xbf16, #tpu.memory_space<vmem>>, vector<32x96xbf16>
    %cst_21 = arith.constant dense<0.000000e+00> : vector<16x96xf32>
    %48 = tpu.matmul %46, %47, %cst_21 {dimension_numbers = #tpu.dot_dimension_numbers<[1], [0], [0], [1], [0, 0, 1, 1], [], []>} : vector<16x32xbf16>, vector<32x96xbf16>, vector<16x96xf32> -> vector<16x96xf32>
    %c0_22 = arith.constant 0 : index
    %c0_23 = arith.constant 0 : index
    %49 = vector.load %arg7[%c0_22, %c0_23] : memref<1x96xf32, #tpu.memory_space<vmem>>, vector<1x96xf32>
    %50 = vector.broadcast %49 : vector<1x96xf32> to vector<16x96xf32>
    %51 = arith.addf %48, %50 : vector<16x96xf32>
    %52 = arith.truncf %51 : vector<16x96xf32> to vector<16x96xbf16>
    %cst_24 = arith.constant 0.000000e+00 : f32
    %53 = vector.broadcast %cst_24 : f32 to vector<16x32xf32>
    %54 = vector.extract_strided_slice %52 {offsets = [0, 0], sizes = [16, 8], strides = [1, 1]} : vector<16x96xbf16> to vector<16x8xbf16>
    %55 = vector.extract_strided_slice %52 {offsets = [0, 32], sizes = [16, 8], strides = [1, 1]} : vector<16x96xbf16> to vector<16x8xbf16>
    %56 = vector.extract_strided_slice %52 {offsets = [0, 64], sizes = [16, 8], strides = [1, 1]} : vector<16x96xbf16> to vector<16x8xbf16>
    %cst_25 = arith.constant dense<0.000000e+00> : vector<16x16xf32>
    %57 = tpu.matmul %54, %55, %cst_25 {dimension_numbers = #tpu.dot_dimension_numbers<[1], [1], [0], [0], [0, 0, 1, 0], [], []>} : vector<16x8xbf16>, vector<16x8xbf16>, vector<16x16xf32> -> vector<16x16xf32>
    %cst_26 = arith.constant 0.353553385 : f32
    %58 = vector.broadcast %cst_26 : f32 to vector<16x16xf32>
    %59 = arith.mulf %57, %58 : vector<16x16xf32>
    %cst_27 = arith.constant dense<0xFF800000> : vector<16xf32>
    %60 = vector.multi_reduction <maximumf>, %59, %cst_27 [1] : vector<16x16xf32> to vector<16xf32>
    %61 = vector.shape_cast %60 : vector<16xf32> to vector<16x1xf32>
    %62 = vector.broadcast %61 : vector<16x1xf32> to vector<16x16xf32>
    %63 = arith.subf %59, %62 : vector<16x16xf32>
    %64 = math.exp %63 : vector<16x16xf32>
    %cst_28 = arith.constant dense<0.000000e+00> : vector<16xf32>
    %65 = vector.multi_reduction <add>, %64, %cst_28 [1] : vector<16x16xf32> to vector<16xf32>
    %66 = vector.shape_cast %65 : vector<16xf32> to vector<16x1xf32>
    %67 = tpu.reciprocal %66 {approx = true} : vector<16x1xf32> -> vector<16x1xf32>
    %68 = vector.broadcast %67 : vector<16x1xf32> to vector<16x16xf32>
    %69 = arith.mulf %64, %68 : vector<16x16xf32>
    %70 = arith.truncf %69 : vector<16x16xf32> to vector<16x16xbf16>
    %cst_29 = arith.constant dense<0.000000e+00> : vector<16x8xf32>
    %71 = tpu.matmul %70, %56, %cst_29 {dimension_numbers = #tpu.dot_dimension_numbers<[1], [0], [0], [1], [0, 0, 1, 1], [], []>} : vector<16x16xbf16>, vector<16x8xbf16>, vector<16x8xf32> -> vector<16x8xf32>
    %72 = arith.truncf %71 : vector<16x8xf32> to vector<16x8xbf16>
    %c0_30 = arith.constant 0 : index
    %c0_31 = arith.constant 0 : index
    %73 = vector.load %arg8[%c0_30, %c0_31] : memref<32x32xbf16, #tpu.memory_space<vmem>>, vector<8x32xbf16>
    %cst_32 = arith.constant dense<0.000000e+00> : vector<16x32xf32>
    %74 = tpu.matmul %72, %73, %cst_32 {dimension_numbers = #tpu.dot_dimension_numbers<[1], [0], [0], [1], [0, 0, 1, 1], [], []>} : vector<16x8xbf16>, vector<8x32xbf16>, vector<16x32xf32> -> vector<16x32xf32>
    %75 = arith.addf %53, %74 : vector<16x32xf32>
    %76 = vector.extract_strided_slice %52 {offsets = [0, 8], sizes = [16, 8], strides = [1, 1]} : vector<16x96xbf16> to vector<16x8xbf16>
    %77 = vector.extract_strided_slice %52 {offsets = [0, 40], sizes = [16, 8], strides = [1, 1]} : vector<16x96xbf16> to vector<16x8xbf16>
    %78 = vector.extract_strided_slice %52 {offsets = [0, 72], sizes = [16, 8], strides = [1, 1]} : vector<16x96xbf16> to vector<16x8xbf16>
    %cst_33 = arith.constant dense<0.000000e+00> : vector<16x16xf32>
    %79 = tpu.matmul %76, %77, %cst_33 {dimension_numbers = #tpu.dot_dimension_numbers<[1], [1], [0], [0], [0, 0, 1, 0], [], []>} : vector<16x8xbf16>, vector<16x8xbf16>, vector<16x16xf32> -> vector<16x16xf32>
    %cst_34 = arith.constant 0.353553385 : f32
    %80 = vector.broadcast %cst_34 : f32 to vector<16x16xf32>
    %81 = arith.mulf %79, %80 : vector<16x16xf32>
    %cst_35 = arith.constant dense<0xFF800000> : vector<16xf32>
    %82 = vector.multi_reduction <maximumf>, %81, %cst_35 [1] : vector<16x16xf32> to vector<16xf32>
    %83 = vector.shape_cast %82 : vector<16xf32> to vector<16x1xf32>
    %84 = vector.broadcast %83 : vector<16x1xf32> to vector<16x16xf32>
    %85 = arith.subf %81, %84 : vector<16x16xf32>
    %86 = math.exp %85 : vector<16x16xf32>
    %cst_36 = arith.constant dense<0.000000e+00> : vector<16xf32>
    %87 = vector.multi_reduction <add>, %86, %cst_36 [1] : vector<16x16xf32> to vector<16xf32>
    %88 = vector.shape_cast %87 : vector<16xf32> to vector<16x1xf32>
    %89 = tpu.reciprocal %88 {approx = true} : vector<16x1xf32> -> vector<16x1xf32>
    %90 = vector.broadcast %89 : vector<16x1xf32> to vector<16x16xf32>
    %91 = arith.mulf %86, %90 : vector<16x16xf32>
    %92 = arith.truncf %91 : vector<16x16xf32> to vector<16x16xbf16>
    %cst_37 = arith.constant dense<0.000000e+00> : vector<16x8xf32>
    %93 = tpu.matmul %92, %78, %cst_37 {dimension_numbers = #tpu.dot_dimension_numbers<[1], [0], [0], [1], [0, 0, 1, 1], [], []>} : vector<16x16xbf16>, vector<16x8xbf16>, vector<16x8xf32> -> vector<16x8xf32>
    %94 = arith.truncf %93 : vector<16x8xf32> to vector<16x8xbf16>
    %c8 = arith.constant 8 : index
    %c0_38 = arith.constant 0 : index
    %95 = vector.load %arg8[%c8, %c0_38] : memref<32x32xbf16, #tpu.memory_space<vmem>>, vector<8x32xbf16>
    %cst_39 = arith.constant dense<0.000000e+00> : vector<16x32xf32>
    %96 = tpu.matmul %94, %95, %cst_39 {dimension_numbers = #tpu.dot_dimension_numbers<[1], [0], [0], [1], [0, 0, 1, 1], [], []>} : vector<16x8xbf16>, vector<8x32xbf16>, vector<16x32xf32> -> vector<16x32xf32>
    %97 = arith.addf %75, %96 : vector<16x32xf32>
    %98 = vector.extract_strided_slice %52 {offsets = [0, 16], sizes = [16, 8], strides = [1, 1]} : vector<16x96xbf16> to vector<16x8xbf16>
    %99 = vector.extract_strided_slice %52 {offsets = [0, 48], sizes = [16, 8], strides = [1, 1]} : vector<16x96xbf16> to vector<16x8xbf16>
    %100 = vector.extract_strided_slice %52 {offsets = [0, 80], sizes = [16, 8], strides = [1, 1]} : vector<16x96xbf16> to vector<16x8xbf16>
    %cst_40 = arith.constant dense<0.000000e+00> : vector<16x16xf32>
    %101 = tpu.matmul %98, %99, %cst_40 {dimension_numbers = #tpu.dot_dimension_numbers<[1], [1], [0], [0], [0, 0, 1, 0], [], []>} : vector<16x8xbf16>, vector<16x8xbf16>, vector<16x16xf32> -> vector<16x16xf32>
    %cst_41 = arith.constant 0.353553385 : f32
    %102 = vector.broadcast %cst_41 : f32 to vector<16x16xf32>
    %103 = arith.mulf %101, %102 : vector<16x16xf32>
    %cst_42 = arith.constant dense<0xFF800000> : vector<16xf32>
    %104 = vector.multi_reduction <maximumf>, %103, %cst_42 [1] : vector<16x16xf32> to vector<16xf32>
    %105 = vector.shape_cast %104 : vector<16xf32> to vector<16x1xf32>
    %106 = vector.broadcast %105 : vector<16x1xf32> to vector<16x16xf32>
    %107 = arith.subf %103, %106 : vector<16x16xf32>
    %108 = math.exp %107 : vector<16x16xf32>
    %cst_43 = arith.constant dense<0.000000e+00> : vector<16xf32>
    %109 = vector.multi_reduction <add>, %108, %cst_43 [1] : vector<16x16xf32> to vector<16xf32>
    %110 = vector.shape_cast %109 : vector<16xf32> to vector<16x1xf32>
    %111 = tpu.reciprocal %110 {approx = true} : vector<16x1xf32> -> vector<16x1xf32>
    %112 = vector.broadcast %111 : vector<16x1xf32> to vector<16x16xf32>
    %113 = arith.mulf %108, %112 : vector<16x16xf32>
    %114 = arith.truncf %113 : vector<16x16xf32> to vector<16x16xbf16>
    %cst_44 = arith.constant dense<0.000000e+00> : vector<16x8xf32>
    %115 = tpu.matmul %114, %100, %cst_44 {dimension_numbers = #tpu.dot_dimension_numbers<[1], [0], [0], [1], [0, 0, 1, 1], [], []>} : vector<16x16xbf16>, vector<16x8xbf16>, vector<16x8xf32> -> vector<16x8xf32>
    %116 = arith.truncf %115 : vector<16x8xf32> to vector<16x8xbf16>
    %c16 = arith.constant 16 : index
    %c0_45 = arith.constant 0 : index
    %117 = vector.load %arg8[%c16, %c0_45] : memref<32x32xbf16, #tpu.memory_space<vmem>>, vector<8x32xbf16>
    %cst_46 = arith.constant dense<0.000000e+00> : vector<16x32xf32>
    %118 = tpu.matmul %116, %117, %cst_46 {dimension_numbers = #tpu.dot_dimension_numbers<[1], [0], [0], [1], [0, 0, 1, 1], [], []>} : vector<16x8xbf16>, vector<8x32xbf16>, vector<16x32xf32> -> vector<16x32xf32>
    %119 = arith.addf %97, %118 : vector<16x32xf32>
    %120 = vector.extract_strided_slice %52 {offsets = [0, 24], sizes = [16, 8], strides = [1, 1]} : vector<16x96xbf16> to vector<16x8xbf16>
    %121 = vector.extract_strided_slice %52 {offsets = [0, 56], sizes = [16, 8], strides = [1, 1]} : vector<16x96xbf16> to vector<16x8xbf16>
    %122 = vector.extract_strided_slice %52 {offsets = [0, 88], sizes = [16, 8], strides = [1, 1]} : vector<16x96xbf16> to vector<16x8xbf16>
    %cst_47 = arith.constant dense<0.000000e+00> : vector<16x16xf32>
    %123 = tpu.matmul %120, %121, %cst_47 {dimension_numbers = #tpu.dot_dimension_numbers<[1], [1], [0], [0], [0, 0, 1, 0], [], []>} : vector<16x8xbf16>, vector<16x8xbf16>, vector<16x16xf32> -> vector<16x16xf32>
    %cst_48 = arith.constant 0.353553385 : f32
    %124 = vector.broadcast %cst_48 : f32 to vector<16x16xf32>
    %125 = arith.mulf %123, %124 : vector<16x16xf32>
    %cst_49 = arith.constant dense<0xFF800000> : vector<16xf32>
    %126 = vector.multi_reduction <maximumf>, %125, %cst_49 [1] : vector<16x16xf32> to vector<16xf32>
    %127 = vector.shape_cast %126 : vector<16xf32> to vector<16x1xf32>
    %128 = vector.broadcast %127 : vector<16x1xf32> to vector<16x16xf32>
    %129 = arith.subf %125, %128 : vector<16x16xf32>
    %130 = math.exp %129 : vector<16x16xf32>
    %cst_50 = arith.constant dense<0.000000e+00> : vector<16xf32>
    %131 = vector.multi_reduction <add>, %130, %cst_50 [1] : vector<16x16xf32> to vector<16xf32>
    %132 = vector.shape_cast %131 : vector<16xf32> to vector<16x1xf32>
    %133 = tpu.reciprocal %132 {approx = true} : vector<16x1xf32> -> vector<16x1xf32>
    %134 = vector.broadcast %133 : vector<16x1xf32> to vector<16x16xf32>
    %135 = arith.mulf %130, %134 : vector<16x16xf32>
    %136 = arith.truncf %135 : vector<16x16xf32> to vector<16x16xbf16>
    %cst_51 = arith.constant dense<0.000000e+00> : vector<16x8xf32>
    %137 = tpu.matmul %136, %122, %cst_51 {dimension_numbers = #tpu.dot_dimension_numbers<[1], [0], [0], [1], [0, 0, 1, 1], [], []>} : vector<16x16xbf16>, vector<16x8xbf16>, vector<16x8xf32> -> vector<16x8xf32>
    %138 = arith.truncf %137 : vector<16x8xf32> to vector<16x8xbf16>
    %c24 = arith.constant 24 : index
    %c0_52 = arith.constant 0 : index
    %139 = vector.load %arg8[%c24, %c0_52] : memref<32x32xbf16, #tpu.memory_space<vmem>>, vector<8x32xbf16>
    %cst_53 = arith.constant dense<0.000000e+00> : vector<16x32xf32>
    %140 = tpu.matmul %138, %139, %cst_53 {dimension_numbers = #tpu.dot_dimension_numbers<[1], [0], [0], [1], [0, 0, 1, 1], [], []>} : vector<16x8xbf16>, vector<8x32xbf16>, vector<16x32xf32> -> vector<16x32xf32>
    %141 = arith.addf %119, %140 : vector<16x32xf32>
    %c0_54 = arith.constant 0 : index
    %c0_55 = arith.constant 0 : index
    %142 = vector.load %arg9[%c0_54, %c0_55] : memref<1x32xf32, #tpu.memory_space<vmem>>, vector<1x32xf32>
    %143 = vector.broadcast %142 : vector<1x32xf32> to vector<16x32xf32>
    %144 = arith.addf %141, %143 : vector<16x32xf32>
    %145 = vector.broadcast %15 : vector<1x32xf32> to vector<16x32xf32>
    %146 = arith.mulf %145, %144 : vector<16x32xf32>
    %147 = arith.addf %5, %146 : vector<16x32xf32>
    %cst_56 = arith.constant dense<0.000000e+00> : vector<16xf32>
    %148 = vector.multi_reduction <add>, %147, %cst_56 [1] : vector<16x32xf32> to vector<16xf32>
    %149 = vector.shape_cast %148 : vector<16xf32> to vector<16x1xf32>
    %cst_57 = arith.constant 3.200000e+01 : f32
    %150 = vector.broadcast %cst_57 : f32 to vector<16x1xf32>
    %151 = arith.divf %149, %150 : vector<16x1xf32>
    %152 = vector.broadcast %151 : vector<16x1xf32> to vector<16x32xf32>
    %153 = arith.subf %147, %152 : vector<16x32xf32>
    %154 = arith.mulf %153, %153 : vector<16x32xf32>
    %cst_58 = arith.constant dense<0.000000e+00> : vector<16xf32>
    %155 = vector.multi_reduction <add>, %154, %cst_58 [1] : vector<16x32xf32> to vector<16xf32>
    %156 = vector.shape_cast %155 : vector<16xf32> to vector<16x1xf32>
    %cst_59 = arith.constant 3.200000e+01 : f32
    %157 = vector.broadcast %cst_59 : f32 to vector<16x1xf32>
    %158 = arith.divf %156, %157 : vector<16x1xf32>
    %159 = vector.broadcast %151 : vector<16x1xf32> to vector<16x32xf32>
    %160 = arith.subf %147, %159 : vector<16x32xf32>
    %cst_60 = arith.constant 9.99999997E-7 : f32
    %161 = vector.broadcast %cst_60 : f32 to vector<16x1xf32>
    %162 = arith.addf %158, %161 : vector<16x1xf32>
    %163 = math.rsqrt %162 : vector<16x1xf32>
    %164 = vector.broadcast %163 : vector<16x1xf32> to vector<16x32xf32>
    %165 = arith.mulf %160, %164 : vector<16x32xf32>
    %cst_61 = arith.constant 1.000000e+00 : f32
    %166 = vector.broadcast %cst_61 : f32 to vector<1x32xf32>
    %167 = arith.addf %166, %19 : vector<1x32xf32>
    %168 = vector.broadcast %167 : vector<1x32xf32> to vector<16x32xf32>
    %169 = arith.mulf %165, %168 : vector<16x32xf32>
    %170 = vector.broadcast %17 : vector<1x32xf32> to vector<16x32xf32>
    %171 = arith.addf %169, %170 : vector<16x32xf32>
    %172 = arith.truncf %171 : vector<16x32xf32> to vector<16x32xbf16>
    %c0_62 = arith.constant 0 : index
    %c0_63 = arith.constant 0 : index
    %173 = vector.load %arg10[%c0_62, %c0_63] : memref<32x128xbf16, #tpu.memory_space<vmem>>, vector<32x128xbf16>
    %cst_64 = arith.constant dense<0.000000e+00> : vector<16x128xf32>
    %174 = tpu.matmul %172, %173, %cst_64 {dimension_numbers = #tpu.dot_dimension_numbers<[1], [0], [0], [1], [0, 0, 1, 1], [], []>} : vector<16x32xbf16>, vector<32x128xbf16>, vector<16x128xf32> -> vector<16x128xf32>
    %c0_65 = arith.constant 0 : index
    %c0_66 = arith.constant 0 : index
    %175 = vector.load %arg11[%c0_65, %c0_66] : memref<1x128xf32, #tpu.memory_space<vmem>>, vector<1x128xf32>
    %176 = vector.broadcast %175 : vector<1x128xf32> to vector<16x128xf32>
    %177 = arith.addf %174, %176 : vector<16x128xf32>
    %178 = arith.mulf %177, %177 : vector<16x128xf32>
    %179 = arith.mulf %177, %178 : vector<16x128xf32>
    %cst_67 = arith.constant 4.471500e-02 : f32
    %180 = vector.broadcast %cst_67 : f32 to vector<16x128xf32>
    %181 = arith.mulf %180, %179 : vector<16x128xf32>
    %182 = arith.addf %177, %181 : vector<16x128xf32>
    %cst_68 = arith.constant 0.797884583 : f32
    %183 = vector.broadcast %cst_68 : f32 to vector<16x128xf32>
    %184 = arith.mulf %183, %182 : vector<16x128xf32>
    %185 = math.tanh %184 : vector<16x128xf32>
    %cst_69 = arith.constant 1.000000e+00 : f32
    %186 = vector.broadcast %cst_69 : f32 to vector<16x128xf32>
    %187 = arith.addf %186, %185 : vector<16x128xf32>
    %cst_70 = arith.constant 5.000000e-01 : f32
    %188 = vector.broadcast %cst_70 : f32 to vector<16x128xf32>
    %189 = arith.mulf %188, %187 : vector<16x128xf32>
    %190 = arith.mulf %177, %189 : vector<16x128xf32>
    %191 = arith.truncf %190 : vector<16x128xf32> to vector<16x128xbf16>
    %c0_71 = arith.constant 0 : index
    %c0_72 = arith.constant 0 : index
    %192 = vector.load %arg12[%c0_71, %c0_72] : memref<128x32xbf16, #tpu.memory_space<vmem>>, vector<128x32xbf16>
    %cst_73 = arith.constant dense<0.000000e+00> : vector<16x32xf32>
    %193 = tpu.matmul %191, %192, %cst_73 {dimension_numbers = #tpu.dot_dimension_numbers<[1], [0], [0], [1], [0, 0, 1, 1], [], []>} : vector<16x128xbf16>, vector<128x32xbf16>, vector<16x32xf32> -> vector<16x32xf32>
    %c0_74 = arith.constant 0 : index
    %c0_75 = arith.constant 0 : index
    %194 = vector.load %arg13[%c0_74, %c0_75] : memref<1x32xf32, #tpu.memory_space<vmem>>, vector<1x32xf32>
    %195 = vector.broadcast %194 : vector<1x32xf32> to vector<16x32xf32>
    %196 = arith.addf %193, %195 : vector<16x32xf32>
    %197 = vector.broadcast %21 : vector<1x32xf32> to vector<16x32xf32>
    %198 = arith.mulf %197, %196 : vector<16x32xf32>
    %199 = arith.addf %147, %198 : vector<16x32xf32>
    %200 = vector.extract_strided_slice %7 {offsets = [1, 0, 0], sizes = [1, 1, 32], strides = [1, 1, 1]} : vector<2x6x32xf32> to vector<1x1x32xf32>
    %201 = vector.shape_cast %200 : vector<1x1x32xf32> to vector<1x32xf32>
    %202 = vector.extract_strided_slice %7 {offsets = [1, 1, 0], sizes = [1, 1, 32], strides = [1, 1, 1]} : vector<2x6x32xf32> to vector<1x1x32xf32>
    %203 = vector.shape_cast %202 : vector<1x1x32xf32> to vector<1x32xf32>
    %204 = vector.extract_strided_slice %7 {offsets = [1, 2, 0], sizes = [1, 1, 32], strides = [1, 1, 1]} : vector<2x6x32xf32> to vector<1x1x32xf32>
    %205 = vector.shape_cast %204 : vector<1x1x32xf32> to vector<1x32xf32>
    %206 = vector.extract_strided_slice %7 {offsets = [1, 3, 0], sizes = [1, 1, 32], strides = [1, 1, 1]} : vector<2x6x32xf32> to vector<1x1x32xf32>
    %207 = vector.shape_cast %206 : vector<1x1x32xf32> to vector<1x32xf32>
    %208 = vector.extract_strided_slice %7 {offsets = [1, 4, 0], sizes = [1, 1, 32], strides = [1, 1, 1]} : vector<2x6x32xf32> to vector<1x1x32xf32>
    %209 = vector.shape_cast %208 : vector<1x1x32xf32> to vector<1x32xf32>
    %210 = vector.extract_strided_slice %7 {offsets = [1, 5, 0], sizes = [1, 1, 32], strides = [1, 1, 1]} : vector<2x6x32xf32> to vector<1x1x32xf32>
    %211 = vector.shape_cast %210 : vector<1x1x32xf32> to vector<1x32xf32>
    %cst_76 = arith.constant dense<0.000000e+00> : vector<16xf32>
    %212 = vector.multi_reduction <add>, %199, %cst_76 [1] : vector<16x32xf32> to vector<16xf32>
    %213 = vector.shape_cast %212 : vector<16xf32> to vector<16x1xf32>
    %cst_77 = arith.constant 3.200000e+01 : f32
    %214 = vector.broadcast %cst_77 : f32 to vector<16x1xf32>
    %215 = arith.divf %213, %214 : vector<16x1xf32>
    %216 = vector.broadcast %215 : vector<16x1xf32> to vector<16x32xf32>
    %217 = arith.subf %199, %216 : vector<16x32xf32>
    %218 = arith.mulf %217, %217 : vector<16x32xf32>
    %cst_78 = arith.constant dense<0.000000e+00> : vector<16xf32>
    %219 = vector.multi_reduction <add>, %218, %cst_78 [1] : vector<16x32xf32> to vector<16xf32>
    %220 = vector.shape_cast %219 : vector<16xf32> to vector<16x1xf32>
    %cst_79 = arith.constant 3.200000e+01 : f32
    %221 = vector.broadcast %cst_79 : f32 to vector<16x1xf32>
    %222 = arith.divf %220, %221 : vector<16x1xf32>
    %223 = vector.broadcast %215 : vector<16x1xf32> to vector<16x32xf32>
    %224 = arith.subf %199, %223 : vector<16x32xf32>
    %cst_80 = arith.constant 9.99999997E-7 : f32
    %225 = vector.broadcast %cst_80 : f32 to vector<16x1xf32>
    %226 = arith.addf %222, %225 : vector<16x1xf32>
    %227 = math.rsqrt %226 : vector<16x1xf32>
    %228 = vector.broadcast %227 : vector<16x1xf32> to vector<16x32xf32>
    %229 = arith.mulf %224, %228 : vector<16x32xf32>
    %cst_81 = arith.constant 1.000000e+00 : f32
    %230 = vector.broadcast %cst_81 : f32 to vector<1x32xf32>
    %231 = arith.addf %230, %203 : vector<1x32xf32>
    %232 = vector.broadcast %231 : vector<1x32xf32> to vector<16x32xf32>
    %233 = arith.mulf %229, %232 : vector<16x32xf32>
    %234 = vector.broadcast %201 : vector<1x32xf32> to vector<16x32xf32>
    %235 = arith.addf %233, %234 : vector<16x32xf32>
    %236 = arith.truncf %235 : vector<16x32xf32> to vector<16x32xbf16>
    %c0_82 = arith.constant 0 : index
    %c0_83 = arith.constant 0 : index
    %237 = vector.load %arg14[%c0_82, %c0_83] : memref<32x96xbf16, #tpu.memory_space<vmem>>, vector<32x96xbf16>
    %cst_84 = arith.constant dense<0.000000e+00> : vector<16x96xf32>
    %238 = tpu.matmul %236, %237, %cst_84 {dimension_numbers = #tpu.dot_dimension_numbers<[1], [0], [0], [1], [0, 0, 1, 1], [], []>} : vector<16x32xbf16>, vector<32x96xbf16>, vector<16x96xf32> -> vector<16x96xf32>
    %c0_85 = arith.constant 0 : index
    %c0_86 = arith.constant 0 : index
    %239 = vector.load %arg15[%c0_85, %c0_86] : memref<1x96xf32, #tpu.memory_space<vmem>>, vector<1x96xf32>
    %240 = vector.broadcast %239 : vector<1x96xf32> to vector<16x96xf32>
    %241 = arith.addf %238, %240 : vector<16x96xf32>
    %242 = arith.truncf %241 : vector<16x96xf32> to vector<16x96xbf16>
    %cst_87 = arith.constant 0.000000e+00 : f32
    %243 = vector.broadcast %cst_87 : f32 to vector<16x32xf32>
    %244 = vector.extract_strided_slice %242 {offsets = [0, 0], sizes = [16, 8], strides = [1, 1]} : vector<16x96xbf16> to vector<16x8xbf16>
    %245 = vector.extract_strided_slice %242 {offsets = [0, 32], sizes = [16, 8], strides = [1, 1]} : vector<16x96xbf16> to vector<16x8xbf16>
    %246 = vector.extract_strided_slice %242 {offsets = [0, 64], sizes = [16, 8], strides = [1, 1]} : vector<16x96xbf16> to vector<16x8xbf16>
    %cst_88 = arith.constant dense<0.000000e+00> : vector<16x16xf32>
    %247 = tpu.matmul %244, %245, %cst_88 {dimension_numbers = #tpu.dot_dimension_numbers<[1], [1], [0], [0], [0, 0, 1, 0], [], []>} : vector<16x8xbf16>, vector<16x8xbf16>, vector<16x16xf32> -> vector<16x16xf32>
    %cst_89 = arith.constant 0.353553385 : f32
    %248 = vector.broadcast %cst_89 : f32 to vector<16x16xf32>
    %249 = arith.mulf %247, %248 : vector<16x16xf32>
    %cst_90 = arith.constant dense<0xFF800000> : vector<16xf32>
    %250 = vector.multi_reduction <maximumf>, %249, %cst_90 [1] : vector<16x16xf32> to vector<16xf32>
    %251 = vector.shape_cast %250 : vector<16xf32> to vector<16x1xf32>
    %252 = vector.broadcast %251 : vector<16x1xf32> to vector<16x16xf32>
    %253 = arith.subf %249, %252 : vector<16x16xf32>
    %254 = math.exp %253 : vector<16x16xf32>
    %cst_91 = arith.constant dense<0.000000e+00> : vector<16xf32>
    %255 = vector.multi_reduction <add>, %254, %cst_91 [1] : vector<16x16xf32> to vector<16xf32>
    %256 = vector.shape_cast %255 : vector<16xf32> to vector<16x1xf32>
    %257 = tpu.reciprocal %256 {approx = true} : vector<16x1xf32> -> vector<16x1xf32>
    %258 = vector.broadcast %257 : vector<16x1xf32> to vector<16x16xf32>
    %259 = arith.mulf %254, %258 : vector<16x16xf32>
    %260 = arith.truncf %259 : vector<16x16xf32> to vector<16x16xbf16>
    %cst_92 = arith.constant dense<0.000000e+00> : vector<16x8xf32>
    %261 = tpu.matmul %260, %246, %cst_92 {dimension_numbers = #tpu.dot_dimension_numbers<[1], [0], [0], [1], [0, 0, 1, 1], [], []>} : vector<16x16xbf16>, vector<16x8xbf16>, vector<16x8xf32> -> vector<16x8xf32>
    %262 = arith.truncf %261 : vector<16x8xf32> to vector<16x8xbf16>
    %c0_93 = arith.constant 0 : index
    %c0_94 = arith.constant 0 : index
    %263 = vector.load %arg16[%c0_93, %c0_94] : memref<32x32xbf16, #tpu.memory_space<vmem>>, vector<8x32xbf16>
    %cst_95 = arith.constant dense<0.000000e+00> : vector<16x32xf32>
    %264 = tpu.matmul %262, %263, %cst_95 {dimension_numbers = #tpu.dot_dimension_numbers<[1], [0], [0], [1], [0, 0, 1, 1], [], []>} : vector<16x8xbf16>, vector<8x32xbf16>, vector<16x32xf32> -> vector<16x32xf32>
    %265 = arith.addf %243, %264 : vector<16x32xf32>
    %266 = vector.extract_strided_slice %242 {offsets = [0, 8], sizes = [16, 8], strides = [1, 1]} : vector<16x96xbf16> to vector<16x8xbf16>
    %267 = vector.extract_strided_slice %242 {offsets = [0, 40], sizes = [16, 8], strides = [1, 1]} : vector<16x96xbf16> to vector<16x8xbf16>
    %268 = vector.extract_strided_slice %242 {offsets = [0, 72], sizes = [16, 8], strides = [1, 1]} : vector<16x96xbf16> to vector<16x8xbf16>
    %cst_96 = arith.constant dense<0.000000e+00> : vector<16x16xf32>
    %269 = tpu.matmul %266, %267, %cst_96 {dimension_numbers = #tpu.dot_dimension_numbers<[1], [1], [0], [0], [0, 0, 1, 0], [], []>} : vector<16x8xbf16>, vector<16x8xbf16>, vector<16x16xf32> -> vector<16x16xf32>
    %cst_97 = arith.constant 0.353553385 : f32
    %270 = vector.broadcast %cst_97 : f32 to vector<16x16xf32>
    %271 = arith.mulf %269, %270 : vector<16x16xf32>
    %cst_98 = arith.constant dense<0xFF800000> : vector<16xf32>
    %272 = vector.multi_reduction <maximumf>, %271, %cst_98 [1] : vector<16x16xf32> to vector<16xf32>
    %273 = vector.shape_cast %272 : vector<16xf32> to vector<16x1xf32>
    %274 = vector.broadcast %273 : vector<16x1xf32> to vector<16x16xf32>
    %275 = arith.subf %271, %274 : vector<16x16xf32>
    %276 = math.exp %275 : vector<16x16xf32>
    %cst_99 = arith.constant dense<0.000000e+00> : vector<16xf32>
    %277 = vector.multi_reduction <add>, %276, %cst_99 [1] : vector<16x16xf32> to vector<16xf32>
    %278 = vector.shape_cast %277 : vector<16xf32> to vector<16x1xf32>
    %279 = tpu.reciprocal %278 {approx = true} : vector<16x1xf32> -> vector<16x1xf32>
    %280 = vector.broadcast %279 : vector<16x1xf32> to vector<16x16xf32>
    %281 = arith.mulf %276, %280 : vector<16x16xf32>
    %282 = arith.truncf %281 : vector<16x16xf32> to vector<16x16xbf16>
    %cst_100 = arith.constant dense<0.000000e+00> : vector<16x8xf32>
    %283 = tpu.matmul %282, %268, %cst_100 {dimension_numbers = #tpu.dot_dimension_numbers<[1], [0], [0], [1], [0, 0, 1, 1], [], []>} : vector<16x16xbf16>, vector<16x8xbf16>, vector<16x8xf32> -> vector<16x8xf32>
    %284 = arith.truncf %283 : vector<16x8xf32> to vector<16x8xbf16>
    %c8_101 = arith.constant 8 : index
    %c0_102 = arith.constant 0 : index
    %285 = vector.load %arg16[%c8_101, %c0_102] : memref<32x32xbf16, #tpu.memory_space<vmem>>, vector<8x32xbf16>
    %cst_103 = arith.constant dense<0.000000e+00> : vector<16x32xf32>
    %286 = tpu.matmul %284, %285, %cst_103 {dimension_numbers = #tpu.dot_dimension_numbers<[1], [0], [0], [1], [0, 0, 1, 1], [], []>} : vector<16x8xbf16>, vector<8x32xbf16>, vector<16x32xf32> -> vector<16x32xf32>
    %287 = arith.addf %265, %286 : vector<16x32xf32>
    %288 = vector.extract_strided_slice %242 {offsets = [0, 16], sizes = [16, 8], strides = [1, 1]} : vector<16x96xbf16> to vector<16x8xbf16>
    %289 = vector.extract_strided_slice %242 {offsets = [0, 48], sizes = [16, 8], strides = [1, 1]} : vector<16x96xbf16> to vector<16x8xbf16>
    %290 = vector.extract_strided_slice %242 {offsets = [0, 80], sizes = [16, 8], strides = [1, 1]} : vector<16x96xbf16> to vector<16x8xbf16>
    %cst_104 = arith.constant dense<0.000000e+00> : vector<16x16xf32>
    %291 = tpu.matmul %288, %289, %cst_104 {dimension_numbers = #tpu.dot_dimension_numbers<[1], [1], [0], [0], [0, 0, 1, 0], [], []>} : vector<16x8xbf16>, vector<16x8xbf16>, vector<16x16xf32> -> vector<16x16xf32>
    %cst_105 = arith.constant 0.353553385 : f32
    %292 = vector.broadcast %cst_105 : f32 to vector<16x16xf32>
    %293 = arith.mulf %291, %292 : vector<16x16xf32>
    %cst_106 = arith.constant dense<0xFF800000> : vector<16xf32>
    %294 = vector.multi_reduction <maximumf>, %293, %cst_106 [1] : vector<16x16xf32> to vector<16xf32>
    %295 = vector.shape_cast %294 : vector<16xf32> to vector<16x1xf32>
    %296 = vector.broadcast %295 : vector<16x1xf32> to vector<16x16xf32>
    %297 = arith.subf %293, %296 : vector<16x16xf32>
    %298 = math.exp %297 : vector<16x16xf32>
    %cst_107 = arith.constant dense<0.000000e+00> : vector<16xf32>
    %299 = vector.multi_reduction <add>, %298, %cst_107 [1] : vector<16x16xf32> to vector<16xf32>
    %300 = vector.shape_cast %299 : vector<16xf32> to vector<16x1xf32>
    %301 = tpu.reciprocal %300 {approx = true} : vector<16x1xf32> -> vector<16x1xf32>
    %302 = vector.broadcast %301 : vector<16x1xf32> to vector<16x16xf32>
    %303 = arith.mulf %298, %302 : vector<16x16xf32>
    %304 = arith.truncf %303 : vector<16x16xf32> to vector<16x16xbf16>
    %cst_108 = arith.constant dense<0.000000e+00> : vector<16x8xf32>
    %305 = tpu.matmul %304, %290, %cst_108 {dimension_numbers = #tpu.dot_dimension_numbers<[1], [0], [0], [1], [0, 0, 1, 1], [], []>} : vector<16x16xbf16>, vector<16x8xbf16>, vector<16x8xf32> -> vector<16x8xf32>
    %306 = arith.truncf %305 : vector<16x8xf32> to vector<16x8xbf16>
    %c16_109 = arith.constant 16 : index
    %c0_110 = arith.constant 0 : index
    %307 = vector.load %arg16[%c16_109, %c0_110] : memref<32x32xbf16, #tpu.memory_space<vmem>>, vector<8x32xbf16>
    %cst_111 = arith.constant dense<0.000000e+00> : vector<16x32xf32>
    %308 = tpu.matmul %306, %307, %cst_111 {dimension_numbers = #tpu.dot_dimension_numbers<[1], [0], [0], [1], [0, 0, 1, 1], [], []>} : vector<16x8xbf16>, vector<8x32xbf16>, vector<16x32xf32> -> vector<16x32xf32>
    %309 = arith.addf %287, %308 : vector<16x32xf32>
    %310 = vector.extract_strided_slice %242 {offsets = [0, 24], sizes = [16, 8], strides = [1, 1]} : vector<16x96xbf16> to vector<16x8xbf16>
    %311 = vector.extract_strided_slice %242 {offsets = [0, 56], sizes = [16, 8], strides = [1, 1]} : vector<16x96xbf16> to vector<16x8xbf16>
    %312 = vector.extract_strided_slice %242 {offsets = [0, 88], sizes = [16, 8], strides = [1, 1]} : vector<16x96xbf16> to vector<16x8xbf16>
    %cst_112 = arith.constant dense<0.000000e+00> : vector<16x16xf32>
    %313 = tpu.matmul %310, %311, %cst_112 {dimension_numbers = #tpu.dot_dimension_numbers<[1], [1], [0], [0], [0, 0, 1, 0], [], []>} : vector<16x8xbf16>, vector<16x8xbf16>, vector<16x16xf32> -> vector<16x16xf32>
    %cst_113 = arith.constant 0.353553385 : f32
    %314 = vector.broadcast %cst_113 : f32 to vector<16x16xf32>
    %315 = arith.mulf %313, %314 : vector<16x16xf32>
    %cst_114 = arith.constant dense<0xFF800000> : vector<16xf32>
    %316 = vector.multi_reduction <maximumf>, %315, %cst_114 [1] : vector<16x16xf32> to vector<16xf32>
    %317 = vector.shape_cast %316 : vector<16xf32> to vector<16x1xf32>
    %318 = vector.broadcast %317 : vector<16x1xf32> to vector<16x16xf32>
    %319 = arith.subf %315, %318 : vector<16x16xf32>
    %320 = math.exp %319 : vector<16x16xf32>
    %cst_115 = arith.constant dense<0.000000e+00> : vector<16xf32>
    %321 = vector.multi_reduction <add>, %320, %cst_115 [1] : vector<16x16xf32> to vector<16xf32>
    %322 = vector.shape_cast %321 : vector<16xf32> to vector<16x1xf32>
    %323 = tpu.reciprocal %322 {approx = true} : vector<16x1xf32> -> vector<16x1xf32>
    %324 = vector.broadcast %323 : vector<16x1xf32> to vector<16x16xf32>
    %325 = arith.mulf %320, %324 : vector<16x16xf32>
    %326 = arith.truncf %325 : vector<16x16xf32> to vector<16x16xbf16>
    %cst_116 = arith.constant dense<0.000000e+00> : vector<16x8xf32>
    %327 = tpu.matmul %326, %312, %cst_116 {dimension_numbers = #tpu.dot_dimension_numbers<[1], [0], [0], [1], [0, 0, 1, 1], [], []>} : vector<16x16xbf16>, vector<16x8xbf16>, vector<16x8xf32> -> vector<16x8xf32>
    %328 = arith.truncf %327 : vector<16x8xf32> to vector<16x8xbf16>
    %c24_117 = arith.constant 24 : index
    %c0_118 = arith.constant 0 : index
    %329 = vector.load %arg16[%c24_117, %c0_118] : memref<32x32xbf16, #tpu.memory_space<vmem>>, vector<8x32xbf16>
    %cst_119 = arith.constant dense<0.000000e+00> : vector<16x32xf32>
    %330 = tpu.matmul %328, %329, %cst_119 {dimension_numbers = #tpu.dot_dimension_numbers<[1], [0], [0], [1], [0, 0, 1, 1], [], []>} : vector<16x8xbf16>, vector<8x32xbf16>, vector<16x32xf32> -> vector<16x32xf32>
    %331 = arith.addf %309, %330 : vector<16x32xf32>
    %c0_120 = arith.constant 0 : index
    %c0_121 = arith.constant 0 : index
    %332 = vector.load %arg17[%c0_120, %c0_121] : memref<1x32xf32, #tpu.memory_space<vmem>>, vector<1x32xf32>
    %333 = vector.broadcast %332 : vector<1x32xf32> to vector<16x32xf32>
    %334 = arith.addf %331, %333 : vector<16x32xf32>
    %335 = vector.broadcast %205 : vector<1x32xf32> to vector<16x32xf32>
    %336 = arith.mulf %335, %334 : vector<16x32xf32>
    %337 = arith.addf %199, %336 : vector<16x32xf32>
    %cst_122 = arith.constant dense<0.000000e+00> : vector<16xf32>
    %338 = vector.multi_reduction <add>, %337, %cst_122 [1] : vector<16x32xf32> to vector<16xf32>
    %339 = vector.shape_cast %338 : vector<16xf32> to vector<16x1xf32>
    %cst_123 = arith.constant 3.200000e+01 : f32
    %340 = vector.broadcast %cst_123 : f32 to vector<16x1xf32>
    %341 = arith.divf %339, %340 : vector<16x1xf32>
    %342 = vector.broadcast %341 : vector<16x1xf32> to vector<16x32xf32>
    %343 = arith.subf %337, %342 : vector<16x32xf32>
    %344 = arith.mulf %343, %343 : vector<16x32xf32>
    %cst_124 = arith.constant dense<0.000000e+00> : vector<16xf32>
    %345 = vector.multi_reduction <add>, %344, %cst_124 [1] : vector<16x32xf32> to vector<16xf32>
    %346 = vector.shape_cast %345 : vector<16xf32> to vector<16x1xf32>
    %cst_125 = arith.constant 3.200000e+01 : f32
    %347 = vector.broadcast %cst_125 : f32 to vector<16x1xf32>
    %348 = arith.divf %346, %347 : vector<16x1xf32>
    %349 = vector.broadcast %341 : vector<16x1xf32> to vector<16x32xf32>
    %350 = arith.subf %337, %349 : vector<16x32xf32>
    %cst_126 = arith.constant 9.99999997E-7 : f32
    %351 = vector.broadcast %cst_126 : f32 to vector<16x1xf32>
    %352 = arith.addf %348, %351 : vector<16x1xf32>
    %353 = math.rsqrt %352 : vector<16x1xf32>
    %354 = vector.broadcast %353 : vector<16x1xf32> to vector<16x32xf32>
    %355 = arith.mulf %350, %354 : vector<16x32xf32>
    %cst_127 = arith.constant 1.000000e+00 : f32
    %356 = vector.broadcast %cst_127 : f32 to vector<1x32xf32>
    %357 = arith.addf %356, %209 : vector<1x32xf32>
    %358 = vector.broadcast %357 : vector<1x32xf32> to vector<16x32xf32>
    %359 = arith.mulf %355, %358 : vector<16x32xf32>
    %360 = vector.broadcast %207 : vector<1x32xf32> to vector<16x32xf32>
    %361 = arith.addf %359, %360 : vector<16x32xf32>
    %362 = arith.truncf %361 : vector<16x32xf32> to vector<16x32xbf16>
    %c0_128 = arith.constant 0 : index
    %c0_129 = arith.constant 0 : index
    %363 = vector.load %arg18[%c0_128, %c0_129] : memref<32x128xbf16, #tpu.memory_space<vmem>>, vector<32x128xbf16>
    %cst_130 = arith.constant dense<0.000000e+00> : vector<16x128xf32>
    %364 = tpu.matmul %362, %363, %cst_130 {dimension_numbers = #tpu.dot_dimension_numbers<[1], [0], [0], [1], [0, 0, 1, 1], [], []>} : vector<16x32xbf16>, vector<32x128xbf16>, vector<16x128xf32> -> vector<16x128xf32>
    %c0_131 = arith.constant 0 : index
    %c0_132 = arith.constant 0 : index
    %365 = vector.load %arg19[%c0_131, %c0_132] : memref<1x128xf32, #tpu.memory_space<vmem>>, vector<1x128xf32>
    %366 = vector.broadcast %365 : vector<1x128xf32> to vector<16x128xf32>
    %367 = arith.addf %364, %366 : vector<16x128xf32>
    %368 = arith.mulf %367, %367 : vector<16x128xf32>
    %369 = arith.mulf %367, %368 : vector<16x128xf32>
    %cst_133 = arith.constant 4.471500e-02 : f32
    %370 = vector.broadcast %cst_133 : f32 to vector<16x128xf32>
    %371 = arith.mulf %370, %369 : vector<16x128xf32>
    %372 = arith.addf %367, %371 : vector<16x128xf32>
    %cst_134 = arith.constant 0.797884583 : f32
    %373 = vector.broadcast %cst_134 : f32 to vector<16x128xf32>
    %374 = arith.mulf %373, %372 : vector<16x128xf32>
    %375 = math.tanh %374 : vector<16x128xf32>
    %cst_135 = arith.constant 1.000000e+00 : f32
    %376 = vector.broadcast %cst_135 : f32 to vector<16x128xf32>
    %377 = arith.addf %376, %375 : vector<16x128xf32>
    %cst_136 = arith.constant 5.000000e-01 : f32
    %378 = vector.broadcast %cst_136 : f32 to vector<16x128xf32>
    %379 = arith.mulf %378, %377 : vector<16x128xf32>
    %380 = arith.mulf %367, %379 : vector<16x128xf32>
    %381 = arith.truncf %380 : vector<16x128xf32> to vector<16x128xbf16>
    %c0_137 = arith.constant 0 : index
    %c0_138 = arith.constant 0 : index
    %382 = vector.load %arg20[%c0_137, %c0_138] : memref<128x32xbf16, #tpu.memory_space<vmem>>, vector<128x32xbf16>
    %cst_139 = arith.constant dense<0.000000e+00> : vector<16x32xf32>
    %383 = tpu.matmul %381, %382, %cst_139 {dimension_numbers = #tpu.dot_dimension_numbers<[1], [0], [0], [1], [0, 0, 1, 1], [], []>} : vector<16x128xbf16>, vector<128x32xbf16>, vector<16x32xf32> -> vector<16x32xf32>
    %c0_140 = arith.constant 0 : index
    %c0_141 = arith.constant 0 : index
    %384 = vector.load %arg21[%c0_140, %c0_141] : memref<1x32xf32, #tpu.memory_space<vmem>>, vector<1x32xf32>
    %385 = vector.broadcast %384 : vector<1x32xf32> to vector<16x32xf32>
    %386 = arith.addf %383, %385 : vector<16x32xf32>
    %387 = vector.broadcast %211 : vector<1x32xf32> to vector<16x32xf32>
    %388 = arith.mulf %387, %386 : vector<16x32xf32>
    %389 = arith.addf %337, %388 : vector<16x32xf32>
    %cst_142 = arith.constant dense<0.000000e+00> : vector<16xf32>
    %390 = vector.multi_reduction <add>, %389, %cst_142 [1] : vector<16x32xf32> to vector<16xf32>
    %391 = vector.shape_cast %390 : vector<16xf32> to vector<16x1xf32>
    %cst_143 = arith.constant 3.200000e+01 : f32
    %392 = vector.broadcast %cst_143 : f32 to vector<16x1xf32>
    %393 = arith.divf %391, %392 : vector<16x1xf32>
    %394 = vector.broadcast %393 : vector<16x1xf32> to vector<16x32xf32>
    %395 = arith.subf %389, %394 : vector<16x32xf32>
    %396 = arith.mulf %395, %395 : vector<16x32xf32>
    %cst_144 = arith.constant dense<0.000000e+00> : vector<16xf32>
    %397 = vector.multi_reduction <add>, %396, %cst_144 [1] : vector<16x32xf32> to vector<16xf32>
    %398 = vector.shape_cast %397 : vector<16xf32> to vector<16x1xf32>
    %cst_145 = arith.constant 3.200000e+01 : f32
    %399 = vector.broadcast %cst_145 : f32 to vector<16x1xf32>
    %400 = arith.divf %398, %399 : vector<16x1xf32>
    %401 = vector.broadcast %393 : vector<16x1xf32> to vector<16x32xf32>
    %402 = arith.subf %389, %401 : vector<16x32xf32>
    %cst_146 = arith.constant 9.99999997E-7 : f32
    %403 = vector.broadcast %cst_146 : f32 to vector<16x1xf32>
    %404 = arith.addf %400, %403 : vector<16x1xf32>
    %405 = math.rsqrt %404 : vector<16x1xf32>
    %406 = vector.broadcast %405 : vector<16x1xf32> to vector<16x32xf32>
    %407 = arith.mulf %402, %406 : vector<16x32xf32>
    %408 = vector.extract_strided_slice %9 {offsets = [1, 0], sizes = [1, 32], strides = [1, 1]} : vector<2x32xf32> to vector<1x32xf32>
    %cst_147 = arith.constant 1.000000e+00 : f32
    %409 = vector.broadcast %cst_147 : f32 to vector<1x32xf32>
    %410 = arith.addf %409, %408 : vector<1x32xf32>
    %411 = vector.broadcast %410 : vector<1x32xf32> to vector<16x32xf32>
    %412 = arith.mulf %407, %411 : vector<16x32xf32>
    %413 = vector.extract_strided_slice %9 {offsets = [0, 0], sizes = [1, 32], strides = [1, 1]} : vector<2x32xf32> to vector<1x32xf32>
    %414 = vector.broadcast %413 : vector<1x32xf32> to vector<16x32xf32>
    %415 = arith.addf %412, %414 : vector<16x32xf32>
    %416 = arith.truncf %415 : vector<16x32xf32> to vector<16x32xbf16>
    %c0_148 = arith.constant 0 : index
    %c0_149 = arith.constant 0 : index
    %417 = vector.load %arg22[%c0_148, %c0_149] : memref<32x128xbf16, #tpu.memory_space<vmem>>, vector<32x128xbf16>
    %cst_150 = arith.constant dense<0.000000e+00> : vector<16x128xf32>
    %418 = tpu.matmul %416, %417, %cst_150 {dimension_numbers = #tpu.dot_dimension_numbers<[1], [0], [0], [1], [0, 0, 1, 1], [], []>} : vector<16x32xbf16>, vector<32x128xbf16>, vector<16x128xf32> -> vector<16x128xf32>
    %c0_151 = arith.constant 0 : index
    %c0_152 = arith.constant 0 : index
    %419 = vector.load %arg23[%c0_151, %c0_152] : memref<1x128xf32, #tpu.memory_space<vmem>>, vector<1x128xf32>
    %420 = vector.broadcast %419 : vector<1x128xf32> to vector<16x128xf32>
    %421 = arith.addf %418, %420 : vector<16x128xf32>
    %422 = vector.shape_cast %421 : vector<16x128xf32> to vector<1x16x128xf32>
    %c0_153 = arith.constant 0 : index
    %c0_154 = arith.constant 0 : index
    %c0_155 = arith.constant 0 : index
    %423 = vector.load %arg24[%c0_153, %c0_154, %c0_155] : memref<1x16x128xf32, #tpu.memory_space<vmem>>, vector<1x16x128xf32>
    tpu.vector_store %arg24[%c0_153, %c0_154, %c0_155], %422 {strides = array<i32>} : memref<1x16x128xf32, #tpu.memory_space<vmem>>, vector<1x16x128xf32>,
    return
  }
  func.func @transform_0(%arg0: i32) -> (i32, i32, i32) {
    %c0_i32 = arith.constant 0 : i32
    %c0_i32_0 = arith.constant 0 : i32
    %c0_i32_1 = arith.constant 0 : i32
    return %arg0, %c0_i32, %c0_i32_0 : i32, i32, i32
  }
  func.func @transform_1(%arg0: i32) -> (i32, i32, i32, i32) {
    %c0_i32 = arith.constant 0 : i32
    %c0_i32_0 = arith.constant 0 : i32
    %c0_i32_1 = arith.constant 0 : i32
    %c0_i32_2 = arith.constant 0 : i32
    return %arg0, %c0_i32, %c0_i32_0, %c0_i32_1 : i32, i32, i32, i32
  }
  func.func @transform_2(%arg0: i32) -> (i32, i32, i32) {
    %c0_i32 = arith.constant 0 : i32
    %c0_i32_0 = arith.constant 0 : i32
    %c0_i32_1 = arith.constant 0 : i32
    return %arg0, %c0_i32, %c0_i32_0 : i32, i32, i32
  }
  func.func @transform_3(%arg0: i32) -> (i32, i32) {
    %c0_i32 = arith.constant 0 : i32
    %c0_i32_0 = arith.constant 0 : i32
    %c0_i32_1 = arith.constant 0 : i32
    return %c0_i32, %c0_i32_0 : i32, i32
  }
  func.func @transform_4(%arg0: i32) -> (i32, i32) {
    %c0_i32 = arith.constant 0 : i32
    %c0_i32_0 = arith.constant 0 : i32
    %c0_i32_1 = arith.constant 0 : i32
    return %c0_i32, %c0_i32_0 : i32, i32
  }
  func.func @transform_5(%arg0: i32) -> (i32, i32) {
    %c0_i32 = arith.constant 0 : i32
    %c0_i32_0 = arith.constant 0 : i32
    %c0_i32_1 = arith.constant 0 : i32
    return %c0_i32, %c0_i32_0 : i32, i32
  }
  func.func @transform_6(%arg0: i32) -> (i32, i32) {
    %c0_i32 = arith.constant 0 : i32
    %c0_i32_0 = arith.constant 0 : i32
    %c0_i32_1 = arith.constant 0 : i32
    return %c0_i32, %c0_i32_0 : i32, i32
  }
  func.func @transform_7(%arg0: i32) -> (i32, i32) {
    %c0_i32 = arith.constant 0 : i32
    %c0_i32_0 = arith.constant 0 : i32
    %c0_i32_1 = arith.constant 0 : i32
    return %c0_i32, %c0_i32_0 : i32, i32
  }
  func.func @transform_8(%arg0: i32) -> (i32, i32) {
    %c0_i32 = arith.constant 0 : i32
    %c0_i32_0 = arith.constant 0 : i32
    %c0_i32_1 = arith.constant 0 : i32
    return %c0_i32, %c0_i32_0 : i32, i32
  }
  func.func @transform_9(%arg0: i32) -> (i32, i32) {
    %c0_i32 = arith.constant 0 : i32
    %c0_i32_0 = arith.constant 0 : i32
    %c0_i32_1 = arith.constant 0 : i32
    return %c0_i32, %c0_i32_0 : i32, i32
  }
  func.func @transform_10(%arg0: i32) -> (i32, i32) {
    %c0_i32 = arith.constant 0 : i32
    %c0_i32_0 = arith.constant 0 : i32
    %c0_i32_1 = arith.constant 0 : i32
    return %c0_i32, %c0_i32_0 : i32, i32
  }
  func.func @transform_11(%arg0: i32) -> (i32, i32) {
    %c0_i32 = arith.constant 0 : i32
    %c0_i32_0 = arith.constant 0 : i32
    %c0_i32_1 = arith.constant 0 : i32
    return %c0_i32, %c0_i32_0 : i32, i32
  }
  func.func @transform_12(%arg0: i32) -> (i32, i32) {
    %c0_i32 = arith.constant 0 : i32
    %c0_i32_0 = arith.constant 0 : i32
    %c0_i32_1 = arith.constant 0 : i32
    return %c0_i32, %c0_i32_0 : i32, i32
  }
  func.func @transform_13(%arg0: i32) -> (i32, i32) {
    %c0_i32 = arith.constant 0 : i32
    %c0_i32_0 = arith.constant 0 : i32
    %c0_i32_1 = arith.constant 0 : i32
    return %c0_i32, %c0_i32_0 : i32, i32
  }
  func.func @transform_14(%arg0: i32) -> (i32, i32) {
    %c0_i32 = arith.constant 0 : i32
    %c0_i32_0 = arith.constant 0 : i32
    %c0_i32_1 = arith.constant 0 : i32
    return %c0_i32, %c0_i32_0 : i32, i32
  }
  func.func @transform_15(%arg0: i32) -> (i32, i32) {
    %c0_i32 = arith.constant 0 : i32
    %c0_i32_0 = arith.constant 0 : i32
    %c0_i32_1 = arith.constant 0 : i32
    return %c0_i32, %c0_i32_0 : i32, i32
  }
  func.func @transform_16(%arg0: i32) -> (i32, i32) {
    %c0_i32 = arith.constant 0 : i32
    %c0_i32_0 = arith.constant 0 : i32
    %c0_i32_1 = arith.constant 0 : i32
    return %c0_i32, %c0_i32_0 : i32, i32
  }
  func.func @transform_17(%arg0: i32) -> (i32, i32) {
    %c0_i32 = arith.constant 0 : i32
    %c0_i32_0 = arith.constant 0 : i32
    %c0_i32_1 = arith.constant 0 : i32
    return %c0_i32, %c0_i32_0 : i32, i32
  }
  func.func @transform_18(%arg0: i32) -> (i32, i32) {
    %c0_i32 = arith.constant 0 : i32
    %c0_i32_0 = arith.constant 0 : i32
    %c0_i32_1 = arith.constant 0 : i32
    return %c0_i32, %c0_i32_0 : i32, i32
  }
  func.func @transform_19(%arg0: i32) -> (i32, i32) {
    %c0_i32 = arith.constant 0 : i32
    %c0_i32_0 = arith.constant 0 : i32
    %c0_i32_1 = arith.constant 0 : i32
    return %c0_i32, %c0_i32_0 : i32, i32
  }
  func.func @transform_20(%arg0: i32) -> (i32, i32) {
    %c0_i32 = arith.constant 0 : i32
    %c0_i32_0 = arith.constant 0 : i32
    %c0_i32_1 = arith.constant 0 : i32
    return %c0_i32, %c0_i32_0 : i32, i32
  }
  func.func @transform_21(%arg0: i32) -> (i32, i32) {
    %c0_i32 = arith.constant 0 : i32
    %c0_i32_0 = arith.constant 0 : i32
    %c0_i32_1 = arith.constant 0 : i32
    return %c0_i32, %c0_i32_0 : i32, i32
  }
  func.func @transform_22(%arg0: i32) -> (i32, i32) {
    %c0_i32 = arith.constant 0 : i32
    %c0_i32_0 = arith.constant 0 : i32
    %c0_i32_1 = arith.constant 0 : i32
    return %c0_i32, %c0_i32_0 : i32, i32
  }
  func.func @transform_23(%arg0: i32) -> (i32, i32, i32) {
    %c0_i32 = arith.constant 0 : i32
    %c0_i32_0 = arith.constant 0 : i32
    %c0_i32_1 = arith.constant 0 : i32
    return %arg0, %c0_i32, %c0_i32_0 : i32, i32, i32
  }
}

</mosaic_0001>

<bundles_post_ra>
// kernel: dit_forward.1
= control target key start
LH: loop header
LB: loop body
LE: loop exit
PB: predicated region body
PF: predicated region fallthrough
CT: control target
= control target key end

     0   :  { %s3220_s0 = inlined_call_operand.vmem [shape: bf16[2,16,64], index: 0, kind: input, shape index: {}]   ;;  %s3221_s1 = inlined_call_operand.vmem [shape: f32[2,2,6,32], index: 1, kind: input, shape index: {}]   ;;  %s3222_s2 = inlined_call_operand.vmem [shape: f32[2,2,32], index: 2, kind: input, shape index: {}]   ;;  %s3223_s3 = inlined_call_operand.vmem [shape: f32[16,32], index: 3, kind: input, shape index: {}]   ;;  %s3224_s4 = inlined_call_operand.vmem [shape: bf16[64,32], index: 4, kind: input, shape index: {}]   ;;  %s3225_s5 = inlined_call_operand.vmem [shape: bf16[32,96], index: 5, kind: input, shape index: {}]   ;;  %s3226_s6 = inlined_call_operand.vmem [shape: f32[1,96], index: 6, kind: input, shape index: {}]   ;;  %s3227_s7 = inlined_call_operand.vmem [shape: bf16[32,32], index: 7, kind: input, shape index: {}]   ;;  %s3228_s8 = inlined_call_operand.vmem [shape: f32[1,32], index: 8, kind: input, shape index: {}]   ;;  %s3229_s9 = inlined_call_operand.vmem [shape: bf16[32,128], index: 9, kind: input, shape index: {}]   ;;  %s3230_s10 = inlined_call_operand.vmem [shape: f32[1,128], index: 10, kind: input, shape index: {}]   ;;  %s3231_s11 = inlined_call_operand.vmem [shape: bf16[128,32], index: 11, kind: input, shape index: {}]   ;;  %s3232_s12 = inlined_call_operand.vmem [shape: f32[1,32], index: 12, kind: input, shape index: {}]   ;;  %s3233_s13 = inlined_call_operand.vmem [shape: bf16[32,96], index: 13, kind: input, shape index: {}]   ;;  %s3234_s14 = inlined_call_operand.vmem [shape: f32[1,96], index: 14, kind: input, shape index: {}]   ;;  %s3235_s15 = inlined_call_operand.vmem [shape: bf16[32,32], index: 15, kind: input, shape index: {}]   ;;  %s3236_s16 = inlined_call_operand.vmem [shape: f32[1,32], index: 16, kind: input, shape index: {}]   ;;  %s3237_s17 = inlined_call_operand.vmem [shape: bf16[32,128], index: 17, kind: input, shape index: {}]   ;;  %s3238_s18 = inlined_call_operand.vmem [shape: f32[1,128], index: 18, kind: input, shape index: {}]   ;;  %s3239_s19 = inlined_call_operand.vmem [shape: bf16[128,32], index: 19, kind: input, shape index: {}]   ;;  %s3240_s20 = inlined_call_operand.vmem [shape: f32[1,32], index: 20, kind: input, shape index: {}]   ;;  %s3241_s21 = inlined_call_operand.vmem [shape: bf16[32,128], index: 21, kind: input, shape index: {}]   ;;  %s3242_s22 = inlined_call_operand.vmem [shape: f32[1,128], index: 22, kind: input, shape index: {}]   ;;  %s3243_s23 = inlined_call_operand.vmem [shape: f32[2,16,128], index: 23, kind: output, shape index: {}]  }
   0x1   :  { %3261 = sst [smem:[#allocation2_spill]] %s3220_s0 }
   0x2   :  { %3262 = sst [smem:[#allocation3_spill]] %s3221_s1 }
   0x3   :  { %3263 = sst [smem:[#allocation4_spill]] %s3222_s2 }
   0x4   :  { %3264 = sst [smem:[#allocation5_spill]] %s3223_s3 }
   0x5   :  { %3265 = sst [smem:[#allocation6_spill]] %s3224_s4  ;;  %s2791_s4 = smov 0  }
   0x6   :  { %3266 = sst [smem:[#allocation7_spill]] %s3225_s5 }
   0x7   :  { %3267 = sst [smem:[#allocation8_spill]] %s3226_s6 }
   0x8   :  { %3268 = sst [smem:[#allocation9_spill]] %s3227_s7 }
   0x9   :  { %3269 = sst [smem:[#allocation10_spill]] %s3228_s8 }
   0xa LB: > { %s2326_s30 = sadd.s32 4294967295, %s2657_s4   ;;  %p2330_p0 = scmp.ge.s32.totalorder %s2657_s4, 1  ;;  %s2657_s4 = sphi %s2791_s4, %s33_s4  }
   0xb   : > { %p656_p1 = scmp.lt.s32.totalorder %s2657_s4, 3 }
   0xd   : > { %p657_p2 = pnand %p2330_p0, %p656_p1 }
   0xe   : > { %s3270_s5 = sld [smem:[#allocation6_spill]] (!%p657_p2)  ;;  %p729_p3 = scmp.lt.s32.totalorder (!%p657_p2), %s2326_s30, 1 }
   0xf   : > { %660 = sbr.rel (%p657_p2) target bundleno = 5147 (0x141b), region = 112  ;;  %s3271_s0 = sld [smem:[#allocation2_spill]] (!%p657_p2) }
  0x10   : > { %s3272_s26 = sld [smem:[#allocation5_spill]] (!%p657_p2)  ;;  %s3253_s29 = smov (!%p657_p2), 64  }
  0x11   : > { %s3273_s28 = sld [smem:[#allocation7_spill]] (!%p657_p2)  ;;  %s3259_s3 = smov (!%p657_p2), 96  }
  0x12   : > { %s3274_s1 = sld [smem:[#allocation3_spill]] (!%p657_p2)  ;;  %s3258_s25 = smov (!%p657_p2), 120  }
  0x13   : > { %s3275_s7 = sld [smem:[#allocation8_spill]] (!%p657_p2)  ;;  %s3256_s6 = smov (!%p657_p2), 72  }
  0x14   : > { %v2501_v0 = vld [vmem:[%s3270_s5 + $0x18] sm:$0xff]  ;;  %v2500_v1 = vld [vmem:[%s3270_s5 + $0x10] sm:$0xff]  ;;  %s3292_s30 = smov (!%p729_p3, %s2326_s30), 1  ;;  %v2499_v2 = vld [vmem:[%s3270_s5 + $0x8] sm:$0xff]  ;;  %vm790_vm0 = vcmask 523264   ;;  %vm811_vm1 = vcmask 261120  }
  0x15   : > { %798 = vmatpush.bf16.msra.mxu0 %v2501_v0  ;;  %s2494_s27 = sshll.u32 %s3292_s30, 3  ;;  %v2498_v3 = vld [vmem:[%s3270_s5] sm:$0xff]  ;;  %v2659_v13 = vmov 32.0   ;;  %vm917_vm9 = vcmask 64512   ;;  %vm940_vm10 = vcmask 130048   ;;  %vm1060_vm11 = vcmask 1043456  }
  0x16   : > { %s733_s24 = scalar_lea.vmem %s3271_s0, %s2494_s27  ;;  %v759_v5 = vld [vmem:[%s3272_s26] sm:$0xff]  ;;  %v760_v9 = vld [vmem:[%s3272_s26 + $0x8] sm:$0xff]  ;;  %2557 = vrcp.f32 %v2659_v13  ;;  %s3248_s0 = sshll.u32 %s3292_s30, 4 }
  0x17   : > { %v2497_v4 = vld [vmem:[%s733_s24] sm:$0xff]  ;;  %v2503_v30 = vld [vmem:[%s3273_s28 + $0x8] sm:$0xff]  ;;  %s3257_s24 = smov 80   ;;  %s3252_s27 = smov 112  }
  0x18   : > { %900 = vmatpush.bf16.msra.mxu1 %v2503_v30  ;;  %v2502_v32 = vld [vmem:[%s3273_s28] sm:$0xff]  ;;  %s2853_s2 = scalar_lea.vmem %s3274_s1, %s3248_s0  ;;  %s3251_s1 = smov 88  }
  0x19   : > { %799 = vmatpush.bf16.msra.mxu0 %v2500_v1  ;;  %v2856_v46 = vld [vmem:[%s2853_s2] sm:$0x3f]  ;;  %s3249_s0 = smov 56   ;;  %s3277_s8 = sld [smem:[#allocation10_spill]] }
  0x1a   : > { %v2859_v48 = vadd.f32 1.0, %v2856_v46  ;;  %v867_v58 = vperm.slane %v2856_v46, 0  ;;  %v2548_v0 = vld [vmem:[%s3275_s7] ss:$0 sm:$0xff]  ;;  %s3250_s7 = smov 104  }
  0x1c   : > { %v2558_v14 = vpop.eup %2557  ;;  %901 = vmatpush.bf16.msra.mxu1 %v2502_v32  ;;  %v864_v53 = vperm.slane %v2859_v48, 1 }
  0x1d   : > { %800 = vmatpush.bf16.msra.mxu0 %v2499_v2  ;;  %v819_v15 = vmul.f32 32.0, %v2558_v14  ;;  %vm823_vm2 = vweird.f32 %v2558_v14 }
  0x1f   : > { %v820_v16 = vsub.f32 1.0, %v819_v15 }
  0x21   : > { %801 = vmatpush.bf16.msra.mxu0 %v2498_v3  ;;  %v821_v17 = vmul.f32 %v2558_v14, %v820_v16 }
  0x23   : > { %v822_v18 = vadd.f32 %v2558_v14, %v821_v17 }
  0x24   : > { %2358 = vmatmul.msk.bf16.vlgmr.msra.gmra.mxu0 %vm790_vm0, %v2497_v4 }
  0x25   : > { %v2831_v19 = vsel %vm823_vm2, %v2558_v14, %v822_v18 }
  0xa1   : > { %v803_v6 = vpop.f32.mrf.mxu0 }
  0xa2   : > { %v2820_v7 = vadd.f32 %v803_v6, %v759_v5 }
  0xa4   : > { %v812_v8 = vsel %vm811_vm1, %v2820_v7, 0.0 }
  0xa5   : > { %813 = vadd.xlane.f32.xlu0 %v812_v8 }
  0xa9   : > { %v805_v10 = vpop.f32.mrf.mxu0 }
  0xaa   : > { %v2827_v11 = vadd.f32 %v805_v10, %v760_v9 }
  0xac   : > { %v815_v12 = vsel %vm811_vm1, %v2827_v11, 0.0 }
  0xad   : > { %816 = vadd.xlane.f32.xlu0 %v815_v12 }
 0x118   : > { %v814_v20 = vpop.xlane.xlu0 %813 }
 0x119   : > { %v825_v21 = vmul.f32 %v2831_v19, %v814_v20 }
 0x11b   : > { %v827_v22 = vsub.f32 %v2820_v7, %v825_v21 }
 0x11d   : > { %v829_v23 = vmul.f32 %v827_v22, %v827_v22 }
 0x11f   : > { %v831_v24 = vsel %vm811_vm1, %v829_v23, 0.0 }
 0x120   : > { %832 = vadd.xlane.f32.xlu1 %v831_v24  ;;  %v817_v25 = vpop.xlane.xlu0 %816 }
 0x121   : > { %v826_v26 = vmul.f32 %v2831_v19, %v817_v25 }
 0x123   : > { %v828_v27 = vsub.f32 %v2827_v11, %v826_v26 }
 0x125   : > { %v830_v28 = vmul.f32 %v828_v27, %v828_v27 }
 0x127   : > { %v834_v29 = vsel %vm811_vm1, %v830_v28, 0.0 }
 0x128   : > { %835 = vadd.xlane.f32.xlu1 %v834_v29 }
 0x193   : > { %v833_v31 = vpop.xlane.xlu1 %832 }
 0x194   : > { %v837_v33 = vmul.f32 %v833_v31, %v2831_v19 }
 0x196   : > { %v839_v34 = vadd.f32 1e-06, %v837_v33 }
 0x198   : > { %2559 = vrsqrt.f32 %v839_v34  ;;  %vm847_vm4 = vweird.f32 %v839_v34 }
 0x19b   : > { %v836_v35 = vpop.xlane.xlu1 %835 }
 0x19c   : > { %v838_v36 = vmul.f32 %v836_v35, %v2831_v19 }
 0x19e   : > { %v2560_v37 = vpop.eup %2559  ;;  %v840_v38 = vadd.f32 1e-06, %v838_v36 }
 0x19f   : > { %v842_v39 = vmul.f32 %v2560_v37, %v839_v34  ;;  %vm848_vm3 = vweird.f32 %v2560_v37 }
 0x1a0   : > { %2561 = vrsqrt.f32 %v840_v38  ;;  %vm849_vm5 = vmor %vm847_vm4, %vm848_vm3  ;;  %vm857_vm7 = vweird.f32 %v840_v38 }
 0x1a1   : > { %v843_v40 = vmul.f32 %v2560_v37, %v842_v39 }
 0x1a3   : > { %v844_v41 = vmul.f32 0.5, %v843_v40 }
 0x1a5   : > { %v845_v42 = vsub.f32 1.5, %v844_v41 }
 0x1a6   : > { %v2562_v43 = vpop.eup %2561 }
 0x1a7   : > { %v846_v44 = vmul.f32 %v2560_v37, %v845_v42  ;;  %v852_v45 = vmul.f32 %v2562_v43, %v840_v38  ;;  %vm858_vm6 = vweird.f32 %v2562_v43 }
 0x1a8   : > { %vm859_vm8 = vmor %vm857_vm7, %vm858_vm6 }
 0x1a9   : > { %v853_v47 = vmul.f32 %v2562_v43, %v852_v45  ;;  %v850_v49 = vsel %vm849_vm5, %v2560_v37, %v846_v44 }
 0x1aa   : > { %v861_v52 = vmul.f32 %v850_v49, %v827_v22 }
 0x1ab   : > { %v854_v50 = vmul.f32 0.5, %v853_v47 }
 0x1ac   : > { %v865_v57 = vmul.f32 %v864_v53, %v861_v52 }
 0x1ad   : > { %v855_v51 = vsub.f32 1.5, %v854_v50 }
 0x1ae   : > { %v868_v60 = vadd.f32 %v867_v58, %v865_v57 }
 0x1af   : > { %v856_v54 = vmul.f32 %v2562_v43, %v855_v51 }
 0x1b1   : > { %v860_v55 = vsel %vm859_vm8, %v2562_v43, %v856_v54 }
 0x1b2   : > { %v862_v56 = vmul.f32 %v860_v55, %v828_v27 }
 0x1b4   : > { %v866_v59 = vmul.f32 %v864_v53, %v862_v56 }
 0x1b6   : > { %v869_v61 = vadd.f32 %v867_v58, %v866_v59 }
 0x1b8   : > { %v870_v62 = vpack.c.bf16 %v869_v61, %v868_v60 }
 0x1ba   : > { %2367 = vmatmul.msk.bf16.vlgmr.msra.gmra.mxu1 %vm811_vm1, %v870_v62 }
 0x237   : > { %v903_v63 = vpop.f32.mrf.mxu1 }
 0x238   : > { %v904_v1 = vadd.f32 %v2548_v0, %v903_v63 }
 0x23a   : > { %v908_v3 = vpack.c.bf16 %v904_v1, %v904_v1 }
 0x23c   : > { %v912_v6 = vunpack.c.l.b16 %v908_v3 }
 0x23f   : > { %v905_v2 = vpop.f32.mrf.mxu1 }
 0x240   : > { %v906_v4 = vadd.f32 %v2548_v0, %v905_v2 }
 0x242   : > { %v909_v5 = vpack.c.bf16 %v906_v4, %v906_v4 }
 0x244   : > { %v913_v8 = vunpack.c.l.b16 %v909_v5 }
 0x246   : > { %v2867_v9 = vpack.c.b16 %v913_v8, %v912_v6 }
 0x248   : > { %964 = vrot.lane.b32.xlu1 %v2867_v9, %s3253_s29  ;;  %915 = vrot.lane.b32.xlu2 %v2867_v9, %s3259_s3  ;;  %s3276_s29 = sld [smem:[#allocation9_spill]]  ;;  %s3279_s3 = smov 120  }
 0x2a2   : > { %v916_v10 = vpop.permute.xlu2 %915 }
 0x2a3   : > { %v922_v12 = vsel %vm917_vm9, %v916_v10, 0 }
 0x2a4   : > { %931 = vmatpush.bf16.xpose.msra.mxu2 %v922_v12 }
 0x2ab   : > { %2368 = vmatmul.msk.bf16.vlgmr.msra.gmra.mxu2 %vm917_vm9, %v2867_v9 }
 0x2ba   : > { %v965_v13 = vpop.permute.xlu1 %964 }
 0x2bb   : > { %977 = vmatpush.bf16.msra.mxu3 %v965_v13 }
 0x32e   : > { %v933_v14 = vpop.f32.mrf.mxu2 }
 0x32f   : > { %v938_v15 = vmul.f32 0.35355338, %v933_v14 }
 0x331   : > { %v941_v16 = vsel %vm940_vm10, %v938_v15, -inf }
 0x332   : > { %942 = vmax.xlane.f32.xlu2 %v941_v16 }
 0x336   : > { %v935_v17 = vpop.f32.mrf.mxu2 }
 0x337   : > { %v939_v18 = vmul.f32 0.35355338, %v935_v17 }
 0x339   : > { %v944_v20 = vsel %vm940_vm10, %v939_v18, -inf }
 0x33a   : > { %945 = vmax.xlane.f32.xlu0 %v944_v20 }
 0x34a   : > { %1100 = vrot.lane.b32.xlu2 %v2867_v9, %s3257_s24  ;;  %s3282_s24 = smov 64  }
 0x3a5   : > { %v943_v21 = vpop.xlane.xlu2 %942 }
 0x3a6   : > { %v947_v22 = vsub.f32 %v938_v15, %v943_v21 }
 0x3a8   : > { %v949_v23 = vmul.f32 1.442695, %v947_v22 }
 0x3aa   : > { %2563 = vpow2.f32 %v949_v23 }
 0x3ad   : > { %v946_v24 = vpop.xlane.xlu0 %945  ;;  %v1101_v39 = vpop.permute.xlu2 %1100 }
 0x3ae   : > { %v948_v25 = vsub.f32 %v939_v18, %v946_v24  ;;  %v1106_v42 = vsel %vm917_vm9, %v1101_v39, 0 }
 0x3b0   : > { %v2564_v26 = vpop.eup %2563  ;;  %v951_v27 = vmul.f32 1.442695, %v948_v25 }
 0x3b1   : > { %v953_v28 = vsel %vm940_vm10, %v2564_v26, 0.0 }
 0x3b2   : > { %2565 = vpow2.f32 %v951_v27  ;;  %954 = vadd.xlane.f32.xlu1 %v953_v28 }
 0x3b8   : > { %v2566_v29 = vpop.eup %2565 }
 0x3b9   : > { %v956_v30 = vsel %vm940_vm10, %v2566_v29, 0.0 }
 0x3ba   : > { %957 = vadd.xlane.f32.xlu0 %v956_v30 }
 0x3cb   : > { %986 = vrot.lane.b32.xlu1 %v2867_v9, %s3258_s25  ;;  %s3280_s25 = smov 80  }
 0x3ce   : > { %988 = vrot.lane.b32.xlu0 %v2867_v9, %s3251_s1  ;;  %s3286_s1 = smov 56  }
 0x3d3   : > { %1193 = vrot.lane.b32.xlu1 %v2867_v9, %s3256_s6  ;;  %s3283_s6 = smov 112  }
 0x3d6   : > { %1098 = vrot.lane.b32.xlu0 %v2867_v9, %s3252_s27  ;;  %s3278_s27 = smov 96  }
 0x3de   : > { %1191 = vrot.lane.b32.xlu0 %v2867_v9, %s3250_s7  ;;  %s3255_s7 = smov 48  }
 0x425   : > { %v955_v31 = vpop.xlane.xlu1 %954 }
 0x426   : > { %2567 = vrcp.f32 %v955_v31 }
 0x42c   : > { %v2568_v33 = vpop.eup %2567 }
 0x42d   : > { %v958_v32 = vpop.xlane.xlu0 %957  ;;  %v961_v35 = vmul.f32 %v2568_v33, %v2564_v26 }
 0x42e   : > { %2569 = vrcp.f32 %v958_v32 }
 0x434   : > { %v2570_v34 = vpop.eup %2569 }
 0x435   : > { %v962_v36 = vmul.f32 %v2570_v34, %v2566_v29 }
 0x437   : > { %v963_v37 = vpack.c.bf16 %v962_v36, %v961_v35 }
 0x439   : > { %2369 = vmatmul.msk.bf16.vlgmr.msra.gmra.mxu3 %vm940_vm10, %v963_v37 }
 0x43d   : > { %v987_v38 = vpop.permute.xlu1 %986 }
 0x440   : > { %v989_v40 = vpop.permute.xlu0 %988 }
 0x441   : > { %v994_v41 = vsel %vm917_vm9, %v989_v40, 0 }
 0x442   : > { %1003 = vmatpush.bf16.xpose.msrb.mxu3 %v994_v41 }
 0x445   : > { %v1194_v43 = vpop.permute.xlu1 %1193 }
 0x446   : > { %v1199_v44 = vsel %vm917_vm9, %v1194_v43, 0 }
 0x447   : > { %1208 = vmatpush.bf16.xpose.msrb.mxu0 %v1199_v44 }
 0x448   : > { %v1099_v45 = vpop.permute.xlu0 %1098 }
 0x449   : > { %2370 = vmatmul.msk.bf16.vlgmr.msrb.gmra.mxu3 %vm917_vm9, %v987_v38 }
 0x44a   : > { %1115 = vmatpush.bf16.xpose.msra.mxu3 %v1106_v42  ;;  %v985_v42 = vld [vmem:[%s3276_s29] sm:$0xf] }
 0x44b   : > { %v1082_v43 = vsel %vm1060_vm11, %v985_v42, 0 }
 0x450   : > { %v1192_v47 = vpop.permute.xlu0 %1191 }
 0x451   : > { %2377 = vmatmul.msk.bf16.vlgmr.msrb.gmra.mxu0 %vm917_vm9, %v1192_v47 }
 0x459   : > { %2374 = vmatmul.msk.bf16.vlgmr.msra.gmra.mxu3 %vm917_vm9, %v1099_v45 }
 0x4bc   : > { %v2899_v49 = vpop.f32.mrf.mxu3 }
 0x4c4   : > { %v2901_v50 = vpop.f32.mrf.mxu3 }
 0x4c5   : > { %v984_v51 = vpack.c.bf16 %v2901_v50, %v2899_v49  ;;  %v1261_v49 = vld [vmem:[%s3276_s29 + $0xc] sm:$0xf] }
 0x4c6   : > { %v1266_v50 = vsel %vm1060_vm11, %v1261_v49, 0 }
 0x4cc   : > { %v1005_v52 = vpop.f32.mrf.mxu3 }
 0x4cd   : > { %v1010_v53 = vmul.f32 0.35355338, %v1005_v52 }
 0x4ce   : > { %v1210_v54 = vpop.f32.mrf.mxu0 }
 0x4cf   : > { %v1012_v55 = vsel %vm940_vm10, %v1010_v53, -inf  ;;  %v1215_v62 = vmul.f32 0.35355338, %v1210_v54 }
 0x4d0   : > { %1013 = vmax.xlane.f32.xlu1 %v1012_v55 }
 0x4d1   : > { %v1217_v1 = vsel %vm940_vm10, %v1215_v62, -inf }
 0x4d4   : > { %v1007_v56 = vpop.f32.mrf.mxu3 }
 0x4d5   : > { %v1011_v57 = vmul.f32 0.35355338, %v1007_v56 }
 0x4d6   : > { %v1212_v58 = vpop.f32.mrf.mxu0 }
 0x4d7   : > { %v1216_v59 = vmul.f32 0.35355338, %v1212_v58  ;;  %v1015_v60 = vsel %vm940_vm10, %v1011_v57, -inf }
 0x4d8   : > { %1016 = vmax.xlane.f32.xlu0 %v1015_v60 }
 0x4d9   : > { %v1220_v61 = vsel %vm940_vm10, %v1216_v59, -inf }
 0x4da   : > { %1221 = vmax.xlane.f32.xlu2 %v1220_v61 }
 0x4dc   : > { %v1117_v63 = vpop.f32.mrf.mxu3 }
 0x4dd   : > { %v1122_v0 = vmul.f32 0.35355338, %v1117_v63 }
 0x4df   : > { %v1124_v2 = vsel %vm940_vm10, %v1122_v0, -inf }
 0x4e0   : > { %1218 = vmax.xlane.f32.xlu0 %v1217_v1 }
 0x4e2   : > { %1125 = vmax.xlane.f32.xlu2 %v1124_v2 }
 0x4e4   : > { %v1119_v3 = vpop.f32.mrf.mxu3 }
 0x4e5   : > { %v1123_v4 = vmul.f32 0.35355338, %v1119_v3 }
 0x4e7   : > { %v1127_v5 = vsel %vm940_vm10, %v1123_v4, -inf }
 0x4e8   : > { %1128 = vmax.xlane.f32.xlu1 %v1127_v5 }
 0x4fa   : > { %1035 = vrot.lane.b32.xlu2 %v2867_v9, %s3249_s0  ;;  %s3254_s0 = smov 40  }
 0x543   : > { %v1014_v14 = vpop.xlane.xlu1 %1013 }
 0x544   : > { %v1018_v20 = vsub.f32 %v1010_v53, %v1014_v14 }
 0x546   : > { %v1020_v24 = vmul.f32 1.442695, %v1018_v20 }
 0x54b   : > { %v1017_v6 = vpop.xlane.xlu0 %1016 }
 0x54c   : > { %v1019_v12 = vsub.f32 %v1011_v57, %v1017_v6  ;;  %v1056_v6 = vld [vmem:[%s3276_s29 + $0x4] sm:$0xf] }
 0x54d   : > { %v1222_v8 = vpop.xlane.xlu2 %1221 }
 0x54e   : > { %v1224_v10 = vsub.f32 %v1216_v59, %v1222_v8  ;;  %v1022_v15 = vmul.f32 1.442695, %v1019_v12  ;;  %v1062_v8 = vsel %vm1060_vm11, %v1056_v6, 0 }
 0x54f   : > { %1071 = vmatpush.bf16.msrb.mxu2 %v1062_v8 }
 0x550   : > { %v1227_v13 = vmul.f32 1.442695, %v1224_v10  ;;  %v1168_v10 = vld [vmem:[%s3276_s29 + $0x8] sm:$0xf] }
 0x551   : > { %v1173_v12 = vsel %vm1060_vm11, %v1168_v10, 0 }
 0x552   : > { %2571 = vpow2.f32 %v1227_v13 }
 0x553   : > { %v1219_v16 = vpop.xlane.xlu0 %1218  ;;  %2573 = vpow2.f32 %v1022_v15  ;;  %1182 = vmatpush.bf16.msra.mxu2 %v1173_v12 }
 0x554   : > { %v1223_v17 = vsub.f32 %v1215_v62, %v1219_v16 }
 0x555   : > { %v1126_v18 = vpop.xlane.xlu2 %1125 }
 0x556   : > { %v1225_v21 = vmul.f32 1.442695, %v1223_v17  ;;  %v1130_v30 = vsub.f32 %v1122_v0, %v1126_v18 }
 0x558   : > { %v2572_v22 = vpop.eup %2571  ;;  %2575 = vpow2.f32 %v1225_v21  ;;  %v1132_v34 = vmul.f32 1.442695, %v1130_v30  ;;  %v2549_v30 = vld [vmem:[%s3277_s8] ss:$0 sm:$0xff]  ;;  %s3281_s8 = smov 72  }
 0x559   : > { %v1232_v23 = vsel %vm940_vm10, %v2572_v22, 0.0  ;;  %v2574_v27 = vpop.eup %2573  ;;  %2577 = vpow2.f32 %v1020_v24 }
 0x55a   : > { %1233 = vadd.xlane.f32.xlu0 %v1232_v23  ;;  %v1027_v33 = vsel %vm940_vm10, %v2574_v27, 0.0 }
 0x55b   : > { %v1129_v25 = vpop.xlane.xlu1 %1128 }
 0x55c   : > { %v1131_v26 = vsub.f32 %v1123_v4, %v1129_v25 }
 0x55d   : > { %v1036_v28 = vpop.permute.xlu2 %1035 }
 0x55e   : > { %v2576_v29 = vpop.eup %2575  ;;  %v1134_v31 = vmul.f32 1.442695, %v1131_v26  ;;  %1048 = vmatpush.bf16.msrb.mxu1 %v1036_v28 }
 0x55f   : > { %v1229_v32 = vsel %vm940_vm10, %v2576_v29, 0.0  ;;  %v2578_v35 = vpop.eup %2577 }
 0x560   : > { %2579 = vpow2.f32 %v1134_v31  ;;  %1230 = vadd.xlane.f32.xlu1 %v1229_v32  ;;  %v1024_v37 = vsel %vm940_vm10, %v2578_v35, 0.0  ;;  %v1290_v32 = vperm.slane %v2856_v46, 2 }
 0x561   : > { %2581 = vpow2.f32 %v1132_v34 }
 0x562   : > { %1028 = vadd.xlane.f32.xlu0 %v1027_v33  ;;  %1091 = vmatpush.bf16.msra.mxu1 %v1082_v43 }
 0x566   : > { %v2580_v36 = vpop.eup %2579 }
 0x567   : > { %v1139_v38 = vsel %vm940_vm10, %v2580_v36, 0.0  ;;  %v2582_v39 = vpop.eup %2581 }
 0x568   : > { %1025 = vadd.xlane.f32.xlu1 %v1024_v37  ;;  %v1136_v40 = vsel %vm940_vm10, %v2582_v39, 0.0 }
 0x56a   : > { %1140 = vadd.xlane.f32.xlu0 %v1139_v38 }
 0x570   : > { %1137 = vadd.xlane.f32.xlu1 %v1136_v40 }
 0x57e   : > { %1240 = vrot.lane.b32.xlu0 %v2867_v9, %s3254_s0  ;;  %s2335_s0 = sshll.u32 %s3292_s30, 1 }
 0x589   : > { %1147 = vrot.lane.b32.xlu1 %v2867_v9, %s3255_s7  ;;  %s3284_s7 = smov 88  }
 0x5cd   : > { %v1234_v41 = vpop.xlane.xlu0 %1233 }
 0x5d3   : > { %v1231_v44 = vpop.xlane.xlu1 %1230 }
 0x5d5   : > { %v1029_v45 = vpop.xlane.xlu0 %1028 }
 0x5d6   : > { %2583 = vrcp.f32 %v1029_v45 }
 0x5db   : > { %v1026_v47 = vpop.xlane.xlu1 %1025 }
 0x5dc   : > { %2585 = vrcp.f32 %v1026_v47  ;;  %v2584_v52 = vpop.eup %2583 }
 0x5dd   : > { %v1033_v54 = vmul.f32 %v2584_v52, %v2574_v27  ;;  %2587 = vrcp.f32 %v1231_v44  ;;  %v1141_v56 = vpop.xlane.xlu0 %1140 }
 0x5de   : > { %2589 = vrcp.f32 %v1234_v41 }
 0x5e2   : > { %v2586_v53 = vpop.eup %2585 }
 0x5e3   : > { %v1032_v55 = vmul.f32 %v2586_v53, %v2578_v35  ;;  %v2588_v57 = vpop.eup %2587  ;;  %v1138_v63 = vpop.xlane.xlu1 %1137 }
 0x5e4   : > { %v2590_v58 = vpop.eup %2589  ;;  %v1237_v59 = vmul.f32 %v2588_v57, %v2576_v29  ;;  %2591 = vrcp.f32 %v1138_v63 }
 0x5e5   : > { %v1034_v9 = vpack.c.bf16 %v1033_v54, %v1032_v55  ;;  %v1238_v60 = vmul.f32 %v2590_v58, %v2572_v22  ;;  %2593 = vrcp.f32 %v1141_v56  ;;  %v2505_v58 = vld [vmem:[%s3229_s9 + $0x8] sm:$0xff] }
 0x5e7   : > { %2371 = vmatmul.msk.bf16.vlgmr.msrb.gmra.mxu1 %vm940_vm10, %v1034_v9  ;;  %v1239_v62 = vpack.c.bf16 %v1238_v60, %v1237_v59 }
 0x5ea   : > { %v2592_v1 = vpop.eup %2591 }
 0x5eb   : > { %v2594_v2 = vpop.eup %2593  ;;  %v1144_v3 = vmul.f32 %v2592_v1, %v2582_v39 }
 0x5ec   : > { %v1145_v4 = vmul.f32 %v2594_v2, %v2580_v36 }
 0x5ee   : > { %v1146_v5 = vpack.c.bf16 %v1145_v4, %v1144_v3 }
 0x5f0   : > { %v1241_v61 = vpop.permute.xlu0 %1240 }
 0x5f1   : > { %1253 = vmatpush.bf16.msrb.mxu3 %v1241_v61  ;;  %v2504_v61 = vld [vmem:[%s3229_s9] sm:$0xff] }
 0x5f4   : > { %2378 = vmatmul.msk.bf16.vlgmr.msrb.gmra.mxu3 %vm940_vm10, %v1239_v62 }
 0x5f7   : > { %2373 = vmatmul.msk.bf16.vlgmr.msra.gmra.mxu1 %vm917_vm9, %v984_v51 }
 0x5fb   : > { %v1148_v0 = vpop.permute.xlu1 %1147 }
 0x5fc   : > { %1160 = vmatpush.bf16.msrb.mxu1 %v1148_v0 }
 0x600   : > { %1275 = vmatpush.bf16.msra.mxu1 %v1266_v50 }
 0x607   : > { %2375 = vmatmul.msk.bf16.vlgmr.msrb.gmra.mxu1 %vm940_vm10, %v1146_v5 }
 0x664   : > { %v1050_v51 = vpop.f32.mrf.mxu1 }
 0x66c   : > { %v1052_v13 = vpop.f32.mrf.mxu1 }
 0x66d   : > { %v1055_v14 = vpack.c.bf16 %v1052_v13, %v1050_v51 }
 0x66f   : > { %2372 = vmatmul.msk.bf16.vlgmr.msrb.gmra.mxu2 %vm917_vm9, %v1055_v14  ;;  %v1339_v14 = vperm.slane %v2859_v48, 4  ;;  %v2512_v48 = vld [vmem:[%s3231_s11 + $0x30] sm:$0xff] }
 0x670   : > { %1375 = vmatpush.bf16.msrb.mxu2 %v2505_v58 }
 0x674   : > { %v1093_v15 = vpop.f32.mrf.mxu1  ;;  %1376 = vmatpush.bf16.msrb.mxu2 %v2504_v61  ;;  %v2551_v61 = vld [vmem:[%s3232_s12] ss:$0 sm:$0xff] }
 0x677   : > { %v1255_v16 = vpop.f32.mrf.mxu3 }
 0x67c   : > { %v1095_v17 = vpop.f32.mrf.mxu1 }
 0x67f   : > { %v1257_v18 = vpop.f32.mrf.mxu3 }
 0x680   : > { %v1260_v20 = vpack.c.bf16 %v1257_v18, %v1255_v16  ;;  %v1342_v18 = vperm.slane %v2856_v46, 3 }
 0x682   : > { %2379 = vmatmul.msk.bf16.vlgmr.msra.gmra.mxu1 %vm917_vm9, %v1260_v20 }
 0x684   : > { %v1162_v21 = vpop.f32.mrf.mxu1 }
 0x68c   : > { %v1164_v22 = vpop.f32.mrf.mxu1 }
 0x68d   : > { %v1167_v23 = vpack.c.bf16 %v1164_v22, %v1162_v21 }
 0x68f   : > { %2376 = vmatmul.msk.bf16.vlgmr.msra.gmra.mxu2 %vm917_vm9, %v1167_v23 }
 0x6f2   : > { %v1073_v24 = vpop.f32.mrf.mxu2 }
 0x6f3   : > { %v1094_v26 = vadd.f32 %v1093_v15, %v1073_v24 }
 0x6fa   : > { %v1075_v25 = vpop.f32.mrf.mxu2 }
 0x6fb   : > { %v1096_v34 = vadd.f32 %v1095_v17, %v1075_v25 }
 0x6ff   : > { %v1277_v27 = vpop.f32.mrf.mxu1 }
 0x707   : > { %v1279_v39 = vpop.f32.mrf.mxu1 }
 0x712   : > { %v1184_v28 = vpop.f32.mrf.mxu2 }
 0x713   : > { %v1189_v29 = vadd.f32 %v1184_v28, %v1094_v26  ;;  %v2513_v26 = vld [vmem:[%s3231_s11 + $0x38] sm:$0xff]  ;;  %v2510_v28 = vld [vmem:[%s3231_s11 + $0x20] sm:$0xff] }
 0x714   : > { %1470 = vmatpush.bf16.msra.mxu0 %v2513_v26 }
 0x715   : > { %v1282_v31 = vadd.f32 %v1277_v27, %v1189_v29  ;;  %v2511_v27 = vld [vmem:[%s3231_s11 + $0x28] sm:$0xff]  ;;  %v2509_v29 = vld [vmem:[%s3231_s11 + $0x18] sm:$0xff] }
 0x717   : > { %v1288_v33 = vadd.f32 %v2549_v30, %v1282_v31  ;;  %v2507_v31 = vld [vmem:[%s3231_s11 + $0x8] sm:$0xff] }
 0x718   : > { %1471 = vmatpush.bf16.msra.mxu0 %v2512_v48 }
 0x719   : > { %v1291_v35 = vmul.f32 %v1290_v32, %v1288_v33  ;;  %v2506_v33 = vld [vmem:[%s3231_s11] sm:$0xff] }
 0x71a   : > { %v1186_v36 = vpop.f32.mrf.mxu2 }
 0x71b   : > { %v1190_v37 = vadd.f32 %v1186_v36, %v1096_v34  ;;  %v2954_v38 = vadd.f32 %v1291_v35, %v2820_v7 }
 0x71c   : > { %1472 = vmatpush.bf16.msra.mxu0 %v2511_v27 }
 0x71d   : > { %v1283_v40 = vadd.f32 %v1279_v39, %v1190_v37  ;;  %v1295_v41 = vsel %vm811_vm1, %v2954_v38, 0.0 }
 0x71e   : > { %1296 = vadd.xlane.f32.xlu2 %v1295_v41 }
 0x71f   : > { %v1289_v42 = vadd.f32 %v2549_v30, %v1283_v40  ;;  %v2508_v30 = vld [vmem:[%s3231_s11 + $0x10] sm:$0xff] }
 0x720   : > { %1473 = vmatpush.bf16.msra.mxu0 %v2510_v28 }
 0x721   : > { %v1292_v43 = vmul.f32 %v1290_v32, %v1289_v42  ;;  %v2550_v32 = vld [vmem:[%s3230_s10] ss:$0 sm:$0xff] }
 0x723   : > { %v2959_v44 = vadd.f32 %v1292_v43, %v2827_v11 }
 0x724   : > { %1474 = vmatpush.bf16.msra.mxu0 %v2509_v29 }
 0x725   : > { %v1298_v45 = vsel %vm811_vm1, %v2959_v44, 0.0 }
 0x726   : > { %1299 = vadd.xlane.f32.xlu0 %v1298_v45 }
 0x728   : > { %1475 = vmatpush.bf16.msra.mxu0 %v2508_v30  ;;  %v3036_v30 = vld [vmem:[%s2853_s2 + $0x8] sm:$0x3f]  ;;  %s3285_s2 = smov 104  }
 0x72c   : > { %1476 = vmatpush.bf16.msra.mxu0 %v2507_v31 }
 0x730   : > { %1477 = vmatpush.bf16.msra.mxu0 %v2506_v33 }
 0x791   : > { %v1297_v47 = vpop.xlane.xlu2 %1296 }
 0x792   : > { %v1301_v52 = vmul.f32 %v1297_v47, %v2831_v19 }
 0x794   : > { %v1303_v7 = vsub.f32 %v2954_v38, %v1301_v52 }
 0x796   : > { %v1305_v53 = vmul.f32 %v1303_v7, %v1303_v7 }
 0x798   : > { %v1307_v54 = vsel %vm811_vm1, %v1305_v53, 0.0 }
 0x799   : > { %1308 = vadd.xlane.f32.xlu1 %v1307_v54  ;;  %v1300_v55 = vpop.xlane.xlu0 %1299 }
 0x79a   : > { %v1302_v9 = vmul.f32 %v1300_v55, %v2831_v19 }
 0x79c   : > { %v1304_v56 = vsub.f32 %v2959_v44, %v1302_v9 }
 0x79e   : > { %v1306_v11 = vmul.f32 %v1304_v56, %v1304_v56 }
 0x7a0   : > { %v1310_v57 = vsel %vm811_vm1, %v1306_v11, 0.0 }
 0x7a1   : > { %1311 = vadd.xlane.f32.xlu2 %v1310_v57 }
 0x80c   : > { %v1309_v59 = vpop.xlane.xlu1 %1308 }
 0x80d   : > { %v1313_v60 = vmul.f32 %v1309_v59, %v2831_v19 }
 0x80f   : > { %v1315_v62 = vadd.f32 1e-06, %v1313_v60 }
 0x811   : > { %2595 = vrsqrt.f32 %v1315_v62  ;;  %vm1323_vm13 = vweird.f32 %v1315_v62 }
 0x814   : > { %v1312_v63 = vpop.xlane.xlu2 %1311 }
 0x815   : > { %v1314_v0 = vmul.f32 %v1312_v63, %v2831_v19 }
 0x817   : > { %v2596_v1 = vpop.eup %2595  ;;  %v1316_v2 = vadd.f32 1e-06, %v1314_v0 }
 0x818   : > { %v1318_v3 = vmul.f32 %v2596_v1, %v1315_v62  ;;  %vm1324_vm12 = vweird.f32 %v2596_v1  ;;  %v1484_v62 = vperm.slane %v2856_v46, 5 }
 0x819   : > { %2597 = vrsqrt.f32 %v1316_v2  ;;  %vm1325_vm14 = vmor %vm1323_vm13, %vm1324_vm12  ;;  %vm1333_vm0 = vweird.f32 %v1316_v2 }
 0x81a   : > { %v1319_v4 = vmul.f32 %v2596_v1, %v1318_v3 }
 0x81c   : > { %v1320_v5 = vmul.f32 0.5, %v1319_v4 }
 0x81e   : > { %v1321_v6 = vsub.f32 1.5, %v1320_v5 }
 0x81f   : > { %v2598_v8 = vpop.eup %2597 }
 0x820   : > { %v1322_v49 = vmul.f32 %v2596_v1, %v1321_v6  ;;  %v1328_v50 = vmul.f32 %v2598_v8, %v1316_v2  ;;  %vm1334_vm15 = vweird.f32 %v2598_v8 }
 0x821   : > { %vm1335_vm2 = vmor %vm1333_vm0, %vm1334_vm15 }
 0x822   : > { %v1329_v51 = vmul.f32 %v2598_v8, %v1328_v50  ;;  %v1326_v10 = vsel %vm1325_vm14, %v2596_v1, %v1322_v49 }
 0x823   : > { %v1337_v15 = vmul.f32 %v1326_v10, %v1303_v7 }
 0x824   : > { %v1330_v12 = vmul.f32 0.5, %v1329_v51 }
 0x825   : > { %v1340_v20 = vmul.f32 %v1339_v14, %v1337_v15 }
 0x826   : > { %v1331_v13 = vsub.f32 1.5, %v1330_v12 }
 0x827   : > { %v1343_v23 = vadd.f32 %v1342_v18, %v1340_v20  ;;  %v2514_v20 = vld [vmem:[%s3233_s13] sm:$0xff] }
 0x828   : > { %v1332_v16 = vmul.f32 %v2598_v8, %v1331_v13 }
 0x82a   : > { %v1336_v17 = vsel %vm1335_vm2, %v2598_v8, %v1332_v16  ;;  %v2515_v16 = vld [vmem:[%s3233_s13 + $0x8] sm:$0xff] }
 0x82b   : > { %v1338_v21 = vmul.f32 %v1336_v17, %v1304_v56  ;;  %1570 = vmatpush.bf16.msra.mxu3 %v2515_v16 }
 0x82d   : > { %v1341_v22 = vmul.f32 %v1339_v14, %v1338_v21 }
 0x82f   : > { %v1344_v24 = vadd.f32 %v1342_v18, %v1341_v22  ;;  %1571 = vmatpush.bf16.msra.mxu3 %v2514_v20 }
 0x831   : > { %v1345_v25 = vpack.c.bf16 %v1344_v24, %v1343_v23 }
 0x833   : > { %2388 = vmatmul.msk.bf16.vlgmr.msrb.gmra.mxu2 %vm811_vm1, %v1345_v25 }
 0x8b6   : > { %v1378_v34 = vpop.f32.mrf.mxu2 }
 0x8b7   : > { %v1379_v35 = vadd.f32 %v2550_v32, %v1378_v34  ;;  %v3039_v34 = vadd.f32 1.0, %v3036_v30 }
 0x8b9   : > { %v1383_v36 = vmul.f32 %v1379_v35, %v1379_v35 }
 0x8bb   : > { %v1385_v37 = vmul.f32 %v1383_v36, %v1379_v35 }
 0x8bd   : > { %v1387_v39 = vmul.f32 0.044715, %v1385_v37 }
 0x8be   : > { %v1380_v40 = vpop.f32.mrf.mxu2 }
 0x8bf   : > { %v1389_v41 = vadd.f32 %v1387_v39, %v1379_v35  ;;  %v1381_v42 = vadd.f32 %v2550_v32, %v1380_v40  ;;  %v1534_v39 = vperm.slane %v3039_v34, 1 }
 0x8c1   : > { %v1391_v43 = vmul.f32 0.7978846, %v1389_v41  ;;  %v1384_v45 = vmul.f32 %v1381_v42, %v1381_v42 }
 0x8c3   : > { %v1386_v47 = vmul.f32 %v1384_v45, %v1381_v42  ;;  %2599 = vtanh.f32 %v1391_v43  ;;  %v1537_v43 = vperm.slane %v3036_v30, 0 }
 0x8c5   : > { %v1388_v52 = vmul.f32 0.044715, %v1386_v47 }
 0x8c7   : > { %v1390_v7 = vadd.f32 %v1388_v52, %v1381_v42 }
 0x8c9   : > { %v1392_v53 = vmul.f32 0.7978846, %v1390_v7  ;;  %v2600_v54 = vpop.eup %2599 }
 0x8ca   : > { %v1395_v55 = vadd.f32 1.0, %v2600_v54 }
 0x8cb   : > { %2601 = vtanh.f32 %v1392_v53 }
 0x8cc   : > { %v1397_v56 = vmul.f32 0.5, %v1395_v55 }
 0x8ce   : > { %v1399_v58 = vmul.f32 %v1397_v56, %v1379_v35 }
 0x8d1   : > { %v2602_v9 = vpop.eup %2601 }
 0x8d2   : > { %v1396_v11 = vadd.f32 1.0, %v2602_v9  ;;  %v2552_v9 = vld [vmem:[%s3234_s14] ss:$0 sm:$0xff] }
 0x8d4   : > { %v1398_v57 = vmul.f32 0.5, %v1396_v11 }
 0x8d6   : > { %v1400_v59 = vmul.f32 %v1398_v57, %v1381_v42 }
 0x8d8   : > { %v1401_v60 = vpack.c.bf16 %v1400_v59, %v1399_v58 }
 0x8da   : > { %1478 = vmatmul.bf16.vlgmr.msra.gmra.mxu0 %v1401_v60 }
 0x957   : > { %v1479_v63 = vpop.f32.mrf.mxu0 }
 0x958   : > { %v1480_v0 = vadd.f32 %v2551_v61, %v1479_v63  ;;  %v1653_v63 = vld [vmem:[%s3235_s15] sm:$0xf] }
 0x95a   : > { %v1485_v1 = vmul.f32 %v1484_v62, %v1480_v0  ;;  %v1749_v0 = vsel %vm1060_vm11, %v1653_v63, 0 }
 0x95b   : > { %1758 = vmatpush.bf16.msrb.mxu0 %v1749_v0 }
 0x95c   : > { %v3012_v2 = vadd.f32 %v1485_v1, %v2954_v38 }
 0x95e   : > { %v1489_v3 = vsel %vm811_vm1, %v3012_v2, 0.0 }
 0x95f   : > { %v1481_v4 = vpop.f32.mrf.mxu0  ;;  %1490 = vadd.xlane.f32.xlu2 %v1489_v3 }
 0x960   : > { %v1482_v5 = vadd.f32 %v2551_v61, %v1481_v4 }
 0x962   : > { %v1486_v6 = vmul.f32 %v1484_v62, %v1482_v5 }
 0x964   : > { %v3017_v8 = vadd.f32 %v1486_v6, %v2959_v44 }
 0x966   : > { %v1492_v49 = vsel %vm811_vm1, %v3017_v8, 0.0 }
 0x967   : > { %1493 = vadd.xlane.f32.xlu2 %v1492_v49 }
 0x9d2   : > { %v1491_v46 = vpop.xlane.xlu2 %1490 }
 0x9d3   : > { %v1495_v50 = vmul.f32 %v1491_v46, %v2831_v19 }
 0x9d5   : > { %v1497_v38 = vsub.f32 %v3012_v2, %v1495_v50 }
 0x9d7   : > { %v1499_v51 = vmul.f32 %v1497_v38, %v1497_v38 }
 0x9d9   : > { %v1501_v10 = vsel %vm811_vm1, %v1499_v51, 0.0 }
 0x9da   : > { %1502 = vadd.xlane.f32.xlu0 %v1501_v10  ;;  %v1494_v12 = vpop.xlane.xlu2 %1493 }
 0x9db   : > { %v1496_v13 = vmul.f32 %v1494_v12, %v2831_v19 }
 0x9dd   : > { %v1498_v14 = vsub.f32 %v3017_v8, %v1496_v13 }
 0x9df   : > { %v1500_v44 = vmul.f32 %v1498_v14, %v1498_v14 }
 0x9e1   : > { %v1504_v15 = vsel %vm811_vm1, %v1500_v44, 0.0 }
 0x9e2   : > { %1505 = vadd.xlane.f32.xlu1 %v1504_v15 }
 0xa4d   : > { %v1503_v17 = vpop.xlane.xlu0 %1502 }
 0xa4e   : > { %v1507_v18 = vmul.f32 %v1503_v17, %v2831_v19 }
 0xa50   : > { %v1509_v21 = vadd.f32 1e-06, %v1507_v18 }
 0xa52   : > { %2603 = vrsqrt.f32 %v1509_v21  ;;  %vm1517_vm4 = vweird.f32 %v1509_v21 }
 0xa55   : > { %v1506_v22 = vpop.xlane.xlu1 %1505 }
 0xa56   : > { %v1508_v23 = vmul.f32 %v1506_v22, %v2831_v19 }
 0xa58   : > { %v2604_v24 = vpop.eup %2603  ;;  %v1510_v25 = vadd.f32 1e-06, %v1508_v23 }
 0xa59   : > { %v1512_v26 = vmul.f32 %v2604_v24, %v1509_v21  ;;  %vm1518_vm3 = vweird.f32 %v2604_v24 }
 0xa5a   : > { %2605 = vrsqrt.f32 %v1510_v25  ;;  %vm1519_vm5 = vmor %vm1517_vm4, %vm1518_vm3  ;;  %vm1527_vm7 = vweird.f32 %v1510_v25 }
 0xa5b   : > { %v1513_v48 = vmul.f32 %v2604_v24, %v1512_v26 }
 0xa5d   : > { %v1514_v27 = vmul.f32 0.5, %v1513_v48 }
 0xa5f   : > { %v1515_v28 = vsub.f32 1.5, %v1514_v27 }
 0xa60   : > { %v2606_v29 = vpop.eup %2605 }
 0xa61   : > { %v1516_v31 = vmul.f32 %v2604_v24, %v1515_v28  ;;  %v1522_v32 = vmul.f32 %v2606_v29, %v1510_v25  ;;  %vm1528_vm6 = vweird.f32 %v2606_v29 }
 0xa62   : > { %vm1529_vm8 = vmor %vm1527_vm7, %vm1528_vm6 }
 0xa63   : > { %v1523_v33 = vmul.f32 %v2606_v29, %v1522_v32  ;;  %v1520_v35 = vsel %vm1519_vm5, %v2604_v24, %v1516_v31 }
 0xa64   : > { %v1531_v40 = vmul.f32 %v1520_v35, %v1497_v38 }
 0xa65   : > { %v1524_v36 = vmul.f32 0.5, %v1523_v33 }
 0xa66   : > { %v1535_v45 = vmul.f32 %v1534_v39, %v1531_v40 }
 0xa67   : > { %v1525_v37 = vsub.f32 1.5, %v1524_v36 }
 0xa68   : > { %v1538_v7 = vadd.f32 %v1537_v43, %v1535_v45 }
 0xa69   : > { %v1526_v41 = vmul.f32 %v2606_v29, %v1525_v37 }
 0xa6b   : > { %v1530_v42 = vsel %vm1529_vm8, %v2606_v29, %v1526_v41 }
 0xa6c   : > { %v1532_v47 = vmul.f32 %v1530_v42, %v1498_v14 }
 0xa6e   : > { %v1536_v52 = vmul.f32 %v1534_v39, %v1532_v47 }
 0xa70   : > { %v1539_v53 = vadd.f32 %v1537_v43, %v1536_v52 }
 0xa72   : > { %v1540_v54 = vpack.c.bf16 %v1539_v53, %v1538_v7 }
 0xa74   : > { %2429 = vmatmul.msk.bf16.vlgmr.msra.gmra.mxu3 %vm811_vm1, %v1540_v54 }
 0xaf7   : > { %v1573_v55 = vpop.f32.mrf.mxu3 }
 0xaf8   : > { %v1574_v56 = vadd.f32 %v2552_v9, %v1573_v55 }
 0xafa   : > { %v1578_v57 = vpack.c.bf16 %v1574_v56, %v1574_v56 }
 0xafc   : > { %v1582_v60 = vunpack.c.l.b16 %v1578_v57 }
 0xaff   : > { %v1575_v11 = vpop.f32.mrf.mxu3 }
 0xb00   : > { %v1576_v58 = vadd.f32 %v2552_v9, %v1575_v11 }
 0xb02   : > { %v1579_v59 = vpack.c.bf16 %v1576_v58, %v1576_v58 }
 0xb04   : > { %v1583_v61 = vunpack.c.l.b16 %v1579_v59 }
 0xb06   : > { %v3047_v62 = vpack.c.b16 %v1583_v61, %v1582_v60 }
 0xb08   : > { %1585 = vrot.lane.b32.xlu2 %v3047_v62, %s3278_s27  ;;  %s3287_s27 = smov 48  }
 0xb10   : > { %1654 = vrot.lane.b32.xlu2 %v3047_v62, %s3279_s3  ;;  %s3288_s3 = smov 40  }
 0xb18   : > { %1767 = vrot.lane.b32.xlu2 %v3047_v62, %s3280_s25 }
 0xb20   : > { %1860 = vrot.lane.b32.xlu2 %v3047_v62, %s3281_s8 }
 0xb62   : > { %v1586_v1 = vpop.permute.xlu2 %1585 }
 0xb63   : > { %v1591_v3 = vsel %vm917_vm9, %v1586_v1, 0 }
 0xb64   : > { %1600 = vmatpush.bf16.xpose.msrb.mxu1 %v1591_v3 }
 0xb6a   : > { %v1655_v4 = vpop.permute.xlu2 %1654 }
 0xb6b   : > { %2430 = vmatmul.msk.bf16.vlgmr.msrb.gmra.mxu1 %vm917_vm9, %v3047_v62 }
 0xb72   : > { %v1768_v5 = vpop.permute.xlu2 %1767 }
 0xb73   : > { %v1773_v33 = vsel %vm917_vm9, %v1768_v5, 0 }
 0xb7a   : > { %v1861_v6 = vpop.permute.xlu2 %1860 }
 0xb7b   : > { %v1866_v49 = vsel %vm917_vm9, %v1861_v6, 0 }
 0xb7c   : > { %1875 = vmatpush.bf16.xpose.msra.mxu0 %v1866_v49 }
 0xbe8   : > { %v1602_v46 = vpop.f32.mrf.mxu1 }
 0xbe9   : > { %v1607_v50 = vmul.f32 0.35355338, %v1602_v46 }
 0xbeb   : > { %v1609_v38 = vsel %vm940_vm10, %v1607_v50, -inf }
 0xbec   : > { %1610 = vmax.xlane.f32.xlu0 %v1609_v38 }
 0xbf0   : > { %v1604_v51 = vpop.f32.mrf.mxu1 }
 0xbf1   : > { %v1608_v10 = vmul.f32 0.35355338, %v1604_v51 }
 0xbf3   : > { %v1612_v12 = vsel %vm940_vm10, %v1608_v10, -inf }
 0xbf4   : > { %1613 = vmax.xlane.f32.xlu1 %v1612_v12 }
 0xc5f   : > { %v1611_v13 = vpop.xlane.xlu0 %1610 }
 0xc60   : > { %v1615_v14 = vsub.f32 %v1607_v50, %v1611_v13 }
 0xc62   : > { %v1617_v44 = vmul.f32 1.442695, %v1615_v14 }
 0xc64   : > { %2607 = vpow2.f32 %v1617_v44 }
 0xc67   : > { %v1614_v15 = vpop.xlane.xlu1 %1613 }
 0xc68   : > { %v1616_v16 = vsub.f32 %v1608_v10, %v1614_v15 }
 0xc6a   : > { %v2608_v17 = vpop.eup %2607  ;;  %v1619_v18 = vmul.f32 1.442695, %v1616_v16 }
 0xc6b   : > { %v1621_v20 = vsel %vm940_vm10, %v2608_v17, 0.0 }
 0xc6c   : > { %2609 = vpow2.f32 %v1619_v18  ;;  %1622 = vadd.xlane.f32.xlu0 %v1621_v20 }
 0xc72   : > { %v2610_v21 = vpop.eup %2609 }
 0xc73   : > { %v1624_v22 = vsel %vm940_vm10, %v2610_v21, 0.0 }
 0xc74   : > { %1625 = vadd.xlane.f32.xlu1 %v1624_v22 }
 0xc80   : > { %1632 = vrot.lane.b32.xlu0 %v3047_v62, %s3282_s24 }
 0xc88   : > { %1765 = vrot.lane.b32.xlu0 %v3047_v62, %s3283_s6 }
 0xc8d   : > { %1656 = vrot.lane.b32.xlu1 %v3047_v62, %s3284_s7  ;;  %s3289_s7 = sld [smem:[#allocation4_spill]] }
 0xc95   : > { %1858 = vrot.lane.b32.xlu1 %v3047_v62, %s3285_s2  ;;  %s742_s2 = scalar_lea.vmem %s3289_s7, %s2335_s0 }
 0xcdf   : > { %v1623_v23 = vpop.xlane.xlu0 %1622 }
 0xce7   : > { %v1626_v24 = vpop.xlane.xlu1 %1625 }
 0xce8   : > { %2611 = vrcp.f32 %v1626_v24 }
 0xce9   : > { %2613 = vrcp.f32 %v1623_v23 }
 0xcee   : > { %v2612_v25 = vpop.eup %2611 }
 0xcef   : > { %v2614_v26 = vpop.eup %2613  ;;  %v1630_v48 = vmul.f32 %v2612_v25, %v2610_v21 }
 0xcf0   : > { %v1629_v27 = vmul.f32 %v2614_v26, %v2608_v17 }
 0xcf2   : > { %v1633_v28 = vpop.permute.xlu0 %1632  ;;  %v1631_v29 = vpack.c.bf16 %v1630_v48, %v1629_v27 }
 0xcf3   : > { %1645 = vmatpush.bf16.msra.mxu2 %v1633_v28 }
 0xcf6   : > { %2431 = vmatmul.msk.bf16.vlgmr.msra.gmra.mxu2 %vm940_vm10, %v1631_v29 }
 0xcfa   : > { %v1766_v35 = vpop.permute.xlu0 %1765 }
 0xcff   : > { %v1657_v31 = vpop.permute.xlu1 %1656 }
 0xd00   : > { %v1662_v32 = vsel %vm917_vm9, %v1657_v31, 0 }
 0xd01   : > { %1671 = vmatpush.bf16.xpose.msrb.mxu3 %v1662_v32 }
 0xd07   : > { %v1859_v43 = vpop.permute.xlu1 %1858 }
 0xd08   : > { %2432 = vmatmul.msk.bf16.vlgmr.msrb.gmra.mxu3 %vm917_vm9, %v1655_v4 }
 0xd09   : > { %1782 = vmatpush.bf16.xpose.msra.mxu3 %v1773_v33 }
 0xd18   : > { %2436 = vmatmul.msk.bf16.vlgmr.msra.gmra.mxu3 %vm917_vm9, %v1766_v35 }
 0xd79   : > { %v1647_v36 = vpop.f32.mrf.mxu2 }
 0xd81   : > { %v1649_v37 = vpop.f32.mrf.mxu2 }
 0xd82   : > { %v1652_v39 = vpack.c.bf16 %v1649_v37, %v1647_v36 }
 0xd84   : > { %2435 = vmatmul.msk.bf16.vlgmr.msrb.gmra.mxu0 %vm917_vm9, %v1652_v39 }
 0xd8b   : > { %v1673_v40 = vpop.f32.mrf.mxu3 }
 0xd8c   : > { %v1678_v41 = vmul.f32 0.35355338, %v1673_v40 }
 0xd8e   : > { %v1680_v42 = vsel %vm940_vm10, %v1678_v41, -inf }
 0xd8f   : > { %1681 = vmax.xlane.f32.xlu0 %v1680_v42 }
 0xd93   : > { %v1675_v45 = vpop.f32.mrf.mxu3 }
 0xd94   : > { %v1679_v47 = vmul.f32 0.35355338, %v1675_v45  ;;  %2439 = vmatmul.msk.bf16.vlgmr.msra.gmra.mxu0 %vm917_vm9, %v1859_v43  ;;  %v1724_v45 = vld [vmem:[%s3235_s15 + $0x4] sm:$0xf] }
 0xd96   : > { %v1683_v52 = vsel %vm940_vm10, %v1679_v47, -inf }
 0xd97   : > { %1684 = vmax.xlane.f32.xlu2 %v1683_v52  ;;  %v1729_v52 = vsel %vm1060_vm11, %v1724_v45, 0 }
 0xd98   : > { %1738 = vmatpush.bf16.msrb.mxu2 %v1729_v52  ;;  %v2516_v52 = vld [vmem:[%s3237_s17] sm:$0xff] }
 0xd9b   : > { %v1784_v7 = vpop.f32.mrf.mxu3 }
 0xd9c   : > { %v1789_v53 = vmul.f32 0.35355338, %v1784_v7 }
 0xd9e   : > { %v1791_v54 = vsel %vm940_vm10, %v1789_v53, -inf }
 0xd9f   : > { %1792 = vmax.xlane.f32.xlu1 %v1791_v54 }
 0xda3   : > { %v1786_v55 = vpop.f32.mrf.mxu3 }
 0xda4   : > { %v1790_v9 = vmul.f32 0.35355338, %v1786_v55 }
 0xda6   : > { %v1794_v56 = vsel %vm940_vm10, %v1790_v9, -inf }
 0xda7   : > { %1795 = vmax.xlane.f32.xlu0 %v1794_v56 }
 0xe01   : > { %v3088_v11 = vpop.f32.mrf.mxu0 }
 0xe02   : > { %v1682_v57 = vpop.xlane.xlu0 %1681 }
 0xe03   : > { %v1686_v58 = vsub.f32 %v1678_v41, %v1682_v57 }
 0xe05   : > { %v1688_v59 = vmul.f32 1.442695, %v1686_v58 }
 0xe07   : > { %2615 = vpow2.f32 %v1688_v59 }
 0xe09   : > { %v3090_v60 = vpop.f32.mrf.mxu0 }
 0xe0a   : > { %v1685_v61 = vpop.xlane.xlu2 %1684 }
 0xe0b   : > { %v1687_v63 = vsub.f32 %v1679_v47, %v1685_v61 }
 0xe0d   : > { %v2616_v0 = vpop.eup %2615  ;;  %v1690_v3 = vmul.f32 1.442695, %v1687_v63 }
 0xe0e   : > { %v1692_v1 = vsel %vm940_vm10, %v2616_v0, 0.0 }
 0xe0f   : > { %1693 = vadd.xlane.f32.xlu0 %v1692_v1  ;;  %2617 = vpow2.f32 %v1690_v3 }
 0xe11   : > { %v1877_v4 = vpop.f32.mrf.mxu0 }
 0xe12   : > { %v1882_v5 = vmul.f32 0.35355338, %v1877_v4  ;;  %v1793_v6 = vpop.xlane.xlu1 %1792  ;;  %v1835_v4 = vld [vmem:[%s3235_s15 + $0x8] sm:$0xf] }
 0xe13   : > { %v1797_v49 = vsub.f32 %v1789_v53, %v1793_v6  ;;  %v1928_v6 = vld [vmem:[%s3235_s15 + $0xc] sm:$0xf] }
 0xe14   : > { %v1884_v46 = vsel %vm940_vm10, %v1882_v5, -inf }
 0xe15   : > { %v1799_v50 = vmul.f32 1.442695, %v1797_v49  ;;  %1885 = vmax.xlane.f32.xlu2 %v1884_v46  ;;  %v2618_v38 = vpop.eup %2617  ;;  %v1933_v49 = vsel %vm1060_vm11, %v1928_v6, 0 }
 0xe16   : > { %v1695_v44 = vsel %vm940_vm10, %v2618_v38, 0.0 }
 0xe17   : > { %2619 = vpow2.f32 %v1799_v50 }
 0xe19   : > { %v1879_v51 = vpop.f32.mrf.mxu0 }
 0xe1a   : > { %v1883_v10 = vmul.f32 0.35355338, %v1879_v51  ;;  %v1796_v12 = vpop.xlane.xlu0 %1795 }
 0xe1b   : > { %v1798_v13 = vsub.f32 %v1790_v9, %v1796_v12 }
 0xe1c   : > { %v1887_v14 = vsel %vm940_vm10, %v1883_v10, -inf }
 0xe1d   : > { %v2620_v15 = vpop.eup %2619  ;;  %v1801_v16 = vmul.f32 1.442695, %v1798_v13  ;;  %1888 = vmax.xlane.f32.xlu1 %v1887_v14  ;;  %1696 = vadd.xlane.f32.xlu2 %v1695_v44 }
 0xe1e   : > { %v1803_v17 = vsel %vm940_vm10, %v2620_v15, 0.0 }
 0xe1f   : > { %2621 = vpow2.f32 %v1801_v16  ;;  %1804 = vadd.xlane.f32.xlu0 %v1803_v17 }
 0xe25   : > { %v2622_v18 = vpop.eup %2621 }
 0xe26   : > { %v1806_v20 = vsel %vm940_vm10, %v2622_v18, 0.0 }
 0xe27   : > { %1807 = vadd.xlane.f32.xlu2 %v1806_v20 }
 0xe36   : > { %1703 = vrot.lane.b32.xlu1 %v3047_v62, %s3286_s1 }
 0xe82   : > { %v1694_v31 = vpop.xlane.xlu0 %1693 }
 0xe88   : > { %v1886_v21 = vpop.xlane.xlu2 %1885 }
 0xe89   : > { %v1890_v22 = vsub.f32 %v1882_v5, %v1886_v21  ;;  %v1840_v5 = vsel %vm1060_vm11, %v1835_v4, 0  ;;  %v1957_v21 = vperm.slane %v3036_v30, 2 }
 0xe8a   : > { %1849 = vmatpush.bf16.msra.mxu2 %v1840_v5  ;;  %v2006_v5 = vperm.slane %v3039_v34, 4  ;;  %v2524_v34 = vld [vmem:[%s3239_s19 + $0x30] sm:$0xff] }
 0xe8b   : > { %v1892_v23 = vmul.f32 1.442695, %v1890_v22 }
 0xe8d   : > { %2623 = vpow2.f32 %v1892_v23 }
 0xe90   : > { %v1889_v24 = vpop.xlane.xlu1 %1888  ;;  %v1697_v28 = vpop.xlane.xlu2 %1696 }
 0xe91   : > { %v1891_v25 = vsub.f32 %v1883_v10, %v1889_v24 }
 0xe92   : > { %v1805_v41 = vpop.xlane.xlu0 %1804 }
 0xe93   : > { %v2624_v26 = vpop.eup %2623  ;;  %v1894_v48 = vmul.f32 1.442695, %v1891_v25 }
 0xe94   : > { %v1896_v27 = vsel %vm940_vm10, %v2624_v26, 0.0 }
 0xe95   : > { %2625 = vpow2.f32 %v1894_v48  ;;  %1897 = vadd.xlane.f32.xlu0 %v1896_v27 }
 0xe96   : > { %2627 = vrcp.f32 %v1697_v28 }
 0xe97   : > { %2629 = vrcp.f32 %v1694_v31 }
 0xe9a   : > { %v1808_v42 = vpop.xlane.xlu2 %1807 }
 0xe9b   : > { %v2626_v29 = vpop.eup %2625 }
 0xe9c   : > { %v1899_v32 = vsel %vm940_vm10, %v2626_v29, 0.0  ;;  %v2628_v33 = vpop.eup %2627 }
 0xe9d   : > { %1900 = vadd.xlane.f32.xlu2 %v1899_v32  ;;  %v2630_v35 = vpop.eup %2629  ;;  %v1701_v36 = vmul.f32 %v2628_v33, %v2618_v38 }
 0xe9e   : > { %v1700_v37 = vmul.f32 %v2630_v35, %v2616_v0 }
 0xea0   : > { %v1702_v40 = vpack.c.bf16 %v1701_v36, %v1700_v37 }
 0xea8   : > { %v1704_v39 = vpop.permute.xlu1 %1703 }
 0xea9   : > { %1716 = vmatpush.bf16.msra.mxu1 %v1704_v39  ;;  %1814 = vrot.lane.b32.xlu0 %v3047_v62, %s3287_s27 }
 0xeac   : > { %2433 = vmatmul.msk.bf16.vlgmr.msra.gmra.mxu1 %vm940_vm10, %v1702_v40 }
 0xeb5   : > { %1907 = vrot.lane.b32.xlu2 %v3047_v62, %s3288_s3  ;;  %s3290_s3 = sshll.u32 %s3292_s30, 4 }
 0xeb6   : > { %s747_s5 = scalar_lea.vmem %s3243_s23, %s3290_s3 }
 0xf08   : > { %v1898_v43 = vpop.xlane.xlu0 %1897 }
 0xf09   : > { %2631 = vrcp.f32 %v1898_v43  ;;  %v2517_v43 = vld [vmem:[%s3237_s17 + $0x8] sm:$0xff] }
 0xf0a   : > { %2633 = vrcp.f32 %v1808_v42 }
 0xf0f   : > { %v2632_v7 = vpop.eup %2631 }
 0xf10   : > { %v1901_v47 = vpop.xlane.xlu2 %1900  ;;  %v2634_v53 = vpop.eup %2633  ;;  %v1904_v62 = vmul.f32 %v2632_v7, %v2624_v26 }
 0xf11   : > { %2635 = vrcp.f32 %v1901_v47  ;;  %v1812_v57 = vmul.f32 %v2634_v53, %v2622_v18  ;;  %v2553_v18 = vld [vmem:[%s3236_s16] ss:$0 sm:$0xff] }
 0xf12   : > { %2637 = vrcp.f32 %v1805_v41 }
 0xf17   : > { %v2636_v54 = vpop.eup %2635 }
 0xf18   : > { %v2638_v55 = vpop.eup %2637  ;;  %v1905_v9 = vmul.f32 %v2636_v54, %v2626_v29  ;;  %v1908_v56 = vpop.permute.xlu2 %1907 }
 0xf19   : > { %1920 = vmatpush.bf16.msrb.mxu3 %v1908_v56  ;;  %v1811_v59 = vmul.f32 %v2638_v55, %v2620_v15 }
 0xf1a   : > { %v1906_v58 = vpack.c.bf16 %v1905_v9, %v1904_v62 }
 0xf1b   : > { %v1815_v61 = vpop.permute.xlu0 %1814  ;;  %v1813_v63 = vpack.c.bf16 %v1812_v57, %v1811_v59 }
 0xf1c   : > { %1827 = vmatpush.bf16.msrb.mxu1 %v1815_v61  ;;  %2440 = vmatmul.msk.bf16.vlgmr.msrb.gmra.mxu3 %vm940_vm10, %v1906_v58 }
 0xf1f   : > { %2437 = vmatmul.msk.bf16.vlgmr.msrb.gmra.mxu1 %vm940_vm10, %v1813_v63 }
 0xf20   : > { %1942 = vmatpush.bf16.msra.mxu1 %v1933_v49 }
 0xf29   : > { %v1718_v0 = vpop.f32.mrf.mxu1 }
 0xf31   : > { %v1720_v1 = vpop.f32.mrf.mxu1 }
 0xf32   : > { %v1723_v3 = vpack.c.bf16 %v1720_v1, %v1718_v0 }
 0xf34   : > { %2434 = vmatmul.msk.bf16.vlgmr.msrb.gmra.mxu2 %vm917_vm9, %v1723_v3 }
 0xf35   : > { %2042 = vmatpush.bf16.msrb.mxu2 %v2517_v43 }
 0xf39   : > { %2043 = vmatpush.bf16.msrb.mxu2 %v2516_v52  ;;  %v2555_v52 = vld [vmem:[%s3240_s20] ss:$0 sm:$0xff] }
 0xf9c   : > { %v1829_v46 = vpop.f32.mrf.mxu1 }
 0xf9f   : > { %v1922_v50 = vpop.f32.mrf.mxu3 }
 0xfa4   : > { %v1831_v38 = vpop.f32.mrf.mxu1 }
 0xfa5   : > { %v1834_v51 = vpack.c.bf16 %v1831_v38, %v1829_v46 }
 0xfa7   : > { %2438 = vmatmul.msk.bf16.vlgmr.msra.gmra.mxu2 %vm917_vm9, %v1834_v51  ;;  %v1924_v10 = vpop.f32.mrf.mxu3 }
 0xfa8   : > { %v1927_v12 = vpack.c.bf16 %v1924_v10, %v1922_v50  ;;  %v2009_v50 = vperm.slane %v3036_v30, 3 }
 0xfaa   : > { %2441 = vmatmul.msk.bf16.vlgmr.msra.gmra.mxu1 %vm917_vm9, %v1927_v12 }
 0xfb7   : > { %v1740_v13 = vpop.f32.mrf.mxu2 }
 0xfb8   : > { %v1761_v44 = vadd.f32 %v3088_v11, %v1740_v13 }
 0xfbf   : > { %v1742_v14 = vpop.f32.mrf.mxu2 }
 0xfc0   : > { %v1763_v23 = vadd.f32 %v3090_v60, %v1742_v14 }
0x1027   : > { %v1944_v15 = vpop.f32.mrf.mxu1 }
0x102a   : > { %v1851_v16 = vpop.f32.mrf.mxu2 }
0x102b   : > { %v1856_v17 = vadd.f32 %v1851_v16, %v1761_v44  ;;  %v2525_v44 = vld [vmem:[%s3239_s19 + $0x38] sm:$0xff]  ;;  %v2522_v16 = vld [vmem:[%s3239_s19 + $0x20] sm:$0xff] }
0x102c   : > { %2137 = vmatpush.bf16.msrb.mxu0 %v2525_v44 }
0x102d   : > { %v1949_v20 = vadd.f32 %v1944_v15, %v1856_v17  ;;  %v2523_v15 = vld [vmem:[%s3239_s19 + $0x28] sm:$0xff]  ;;  %v2521_v17 = vld [vmem:[%s3239_s19 + $0x18] sm:$0xff] }
0x102f   : > { %v1955_v22 = vadd.f32 %v2553_v18, %v1949_v20  ;;  %v1946_v11 = vpop.f32.mrf.mxu1  ;;  %v2519_v20 = vld [vmem:[%s3239_s19 + $0x8] sm:$0xff] }
0x1030   : > { %2138 = vmatpush.bf16.msrb.mxu0 %v2524_v34 }
0x1031   : > { %v1958_v24 = vmul.f32 %v1957_v21, %v1955_v22  ;;  %v2518_v22 = vld [vmem:[%s3239_s19] sm:$0xff] }
0x1032   : > { %v1853_v25 = vpop.f32.mrf.mxu2 }
0x1033   : > { %v1857_v26 = vadd.f32 %v1853_v25, %v1763_v23  ;;  %v3131_v48 = vadd.f32 %v1958_v24, %v3012_v2 }
0x1034   : > { %2139 = vmatpush.bf16.msrb.mxu0 %v2523_v15 }
0x1035   : > { %v1950_v27 = vadd.f32 %v1946_v11, %v1857_v26  ;;  %v1962_v28 = vsel %vm811_vm1, %v3131_v48, 0.0 }
0x1036   : > { %1963 = vadd.xlane.f32.xlu1 %v1962_v28 }
0x1037   : > { %v1956_v29 = vadd.f32 %v2553_v18, %v1950_v27  ;;  %v2520_v18 = vld [vmem:[%s3239_s19 + $0x10] sm:$0xff] }
0x1038   : > { %2140 = vmatpush.bf16.msrb.mxu0 %v2522_v16 }
0x1039   : > { %v1959_v31 = vmul.f32 %v1957_v21, %v1956_v29  ;;  %v2554_v21 = vld [vmem:[%s3238_s18] ss:$0 sm:$0xff] }
0x103b   : > { %v3136_v32 = vadd.f32 %v1959_v31, %v3017_v8 }
0x103c   : > { %2141 = vmatpush.bf16.msrb.mxu0 %v2521_v17 }
0x103d   : > { %v1965_v60 = vsel %vm811_vm1, %v3136_v32, 0.0 }
0x103e   : > { %1966 = vadd.xlane.f32.xlu0 %v1965_v60 }
0x1040   : > { %2142 = vmatpush.bf16.msrb.mxu0 %v2520_v18  ;;  %v810_v18 = vld [vmem:[%s742_s2] sm:$0x3] }
0x1044   : > { %2143 = vmatpush.bf16.msrb.mxu0 %v2519_v20 }
0x1048   : > { %2144 = vmatpush.bf16.msrb.mxu0 %v2518_v22 }
0x10a9   : > { %v1964_v33 = vpop.xlane.xlu1 %1963 }
0x10aa   : > { %v1968_v35 = vmul.f32 %v1964_v33, %v2831_v19 }
0x10ac   : > { %v1970_v2 = vsub.f32 %v3131_v48, %v1968_v35 }
0x10ae   : > { %v1972_v36 = vmul.f32 %v1970_v2, %v1970_v2 }
0x10b0   : > { %v1974_v37 = vsel %vm811_vm1, %v1972_v36, 0.0 }
0x10b1   : > { %1975 = vadd.xlane.f32.xlu2 %v1974_v37  ;;  %v1967_v39 = vpop.xlane.xlu0 %1966 }
0x10b2   : > { %v1969_v40 = vmul.f32 %v1967_v39, %v2831_v19 }
0x10b4   : > { %v1971_v41 = vsub.f32 %v3136_v32, %v1969_v40 }
0x10b6   : > { %v1973_v8 = vmul.f32 %v1971_v41, %v1971_v41 }
0x10b8   : > { %v1977_v42 = vsel %vm811_vm1, %v1973_v8, 0.0 }
0x10b9   : > { %1978 = vadd.xlane.f32.xlu1 %v1977_v42 }
0x1124   : > { %v1976_v45 = vpop.xlane.xlu2 %1975 }
0x1125   : > { %v1980_v47 = vmul.f32 %v1976_v45, %v2831_v19 }
0x1127   : > { %v1982_v7 = vadd.f32 1e-06, %v1980_v47 }
0x1129   : > { %2639 = vrsqrt.f32 %v1982_v7  ;;  %vm1990_vm10 = vweird.f32 %v1982_v7 }
0x112c   : > { %v1979_v53 = vpop.xlane.xlu1 %1978 }
0x112d   : > { %v1981_v54 = vmul.f32 %v1979_v53, %v2831_v19 }
0x112f   : > { %v2640_v55 = vpop.eup %2639  ;;  %v1983_v62 = vadd.f32 1e-06, %v1981_v54 }
0x1130   : > { %v1985_v9 = vmul.f32 %v2640_v55, %v1982_v7  ;;  %vm1991_vm9 = vweird.f32 %v2640_v55  ;;  %v2151_v7 = vperm.slane %v3036_v30, 5 }
0x1131   : > { %2641 = vrsqrt.f32 %v1983_v62  ;;  %vm1992_vm11 = vmor %vm1990_vm10, %vm1991_vm9  ;;  %vm2000_vm13 = vweird.f32 %v1983_v62 }
0x1132   : > { %v1986_v56 = vmul.f32 %v2640_v55, %v1985_v9 }
0x1134   : > { %v1987_v57 = vmul.f32 0.5, %v1986_v56 }
0x1136   : > { %v1988_v58 = vsub.f32 1.5, %v1987_v57 }
0x1137   : > { %v2642_v59 = vpop.eup %2641 }
0x1138   : > { %v1989_v61 = vmul.f32 %v2640_v55, %v1988_v58  ;;  %v1995_v63 = vmul.f32 %v2642_v59, %v1983_v62  ;;  %vm2001_vm12 = vweird.f32 %v2642_v59 }
0x1139   : > { %vm2002_vm14 = vmor %vm2000_vm13, %vm2001_vm12 }
0x113a   : > { %v1996_v0 = vmul.f32 %v2642_v59, %v1995_v63  ;;  %v1993_v1 = vsel %vm1992_vm11, %v2640_v55, %v1989_v61 }
0x113b   : > { %v2004_v6 = vmul.f32 %v1993_v1, %v1970_v2 }
0x113c   : > { %v1997_v3 = vmul.f32 0.5, %v1996_v0 }
0x113d   : > { %v2007_v38 = vmul.f32 %v2006_v5, %v2004_v6 }
0x113e   : > { %v1998_v4 = vsub.f32 1.5, %v1997_v3 }
0x113f   : > { %v2010_v12 = vadd.f32 %v2009_v50, %v2007_v38  ;;  %v2526_v38 = vld [vmem:[%s3241_s21] sm:$0xff] }
0x1140   : > { %v1999_v49 = vmul.f32 %v2642_v59, %v1998_v4 }
0x1142   : > { %v2003_v46 = vsel %vm2002_vm14, %v2642_v59, %v1999_v49 }
0x1143   : > { %v2005_v51 = vmul.f32 %v2003_v46, %v1971_v41 }
0x1145   : > { %v2008_v10 = vmul.f32 %v2006_v5, %v2005_v51 }
0x1147   : > { %v2011_v13 = vadd.f32 %v2009_v50, %v2008_v10 }
0x1149   : > { %v2012_v14 = vpack.c.bf16 %v2011_v13, %v2010_v12 }
0x114b   : > { %2450 = vmatmul.msk.bf16.vlgmr.msrb.gmra.mxu2 %vm811_vm1, %v2012_v14 }
0x11ce   : > { %v2045_v23 = vpop.f32.mrf.mxu2 }
0x11cf   : > { %v2046_v24 = vadd.f32 %v2554_v21, %v2045_v23 }
0x11d1   : > { %v2050_v25 = vmul.f32 %v2046_v24, %v2046_v24 }
0x11d3   : > { %v2052_v26 = vmul.f32 %v2050_v25, %v2046_v24 }
0x11d5   : > { %v2054_v11 = vmul.f32 0.044715, %v2052_v26 }
0x11d6   : > { %v2047_v27 = vpop.f32.mrf.mxu2 }
0x11d7   : > { %v2056_v28 = vadd.f32 %v2054_v11, %v2046_v24  ;;  %v2048_v29 = vadd.f32 %v2554_v21, %v2047_v27 }
0x11d9   : > { %v2058_v31 = vmul.f32 0.7978846, %v2056_v28  ;;  %v2051_v60 = vmul.f32 %v2048_v29, %v2048_v29 }
0x11db   : > { %v2053_v33 = vmul.f32 %v2051_v60, %v2048_v29  ;;  %2643 = vtanh.f32 %v2058_v31 }
0x11dd   : > { %v2055_v35 = vmul.f32 0.044715, %v2053_v33 }
0x11df   : > { %v2057_v2 = vadd.f32 %v2055_v35, %v2048_v29 }
0x11e1   : > { %v2059_v36 = vmul.f32 0.7978846, %v2057_v2  ;;  %v2644_v37 = vpop.eup %2643 }
0x11e2   : > { %v2062_v39 = vadd.f32 1.0, %v2644_v37  ;;  %v2556_v37 = vld [vmem:[%s3242_s22] ss:$0 sm:$0xff] }
0x11e3   : > { %2645 = vtanh.f32 %v2059_v36 }
0x11e4   : > { %v2064_v41 = vmul.f32 0.5, %v2062_v39 }
0x11e6   : > { %v2066_v43 = vmul.f32 %v2064_v41, %v2046_v24 }
0x11e9   : > { %v2646_v40 = vpop.eup %2645 }
0x11ea   : > { %v2063_v8 = vadd.f32 1.0, %v2646_v40 }
0x11ec   : > { %v2065_v42 = vmul.f32 0.5, %v2063_v8 }
0x11ee   : > { %v2067_v45 = vmul.f32 %v2065_v42, %v2048_v29  ;;  %v2204_v29 = vperm.slane %v810_v18, 0 }
0x11f0   : > { %v2068_v47 = vpack.c.bf16 %v2067_v45, %v2066_v43 }
0x11f2   : > { %2145 = vmatmul.bf16.vlgmr.msrb.gmra.mxu0 %v2068_v47 }
0x126f   : > { %v2146_v53 = vpop.f32.mrf.mxu0 }
0x1270   : > { %v2147_v54 = vadd.f32 %v2555_v52, %v2146_v53 }
0x1272   : > { %v2152_v55 = vmul.f32 %v2151_v7, %v2147_v54 }
0x1274   : > { %v2154_v62 = vadd.f32 %v2152_v55, %v3131_v48 }
0x1276   : > { %v2156_v9 = vsel %vm811_vm1, %v2154_v62, 0.0 }
0x1277   : > { %v2148_v56 = vpop.f32.mrf.mxu0  ;;  %2157 = vadd.xlane.f32.xlu1 %v2156_v9 }
0x1278   : > { %v2149_v57 = vadd.f32 %v2555_v52, %v2148_v56 }
0x127a   : > { %v2153_v58 = vmul.f32 %v2151_v7, %v2149_v57 }
0x127c   : > { %v2155_v59 = vadd.f32 %v2153_v58, %v3136_v32  ;;  %v2527_v32 = vld [vmem:[%s3241_s21 + $0x8] sm:$0xff] }
0x127d   : > { %2237 = vmatpush.bf16.msra.mxu3 %v2527_v32 }
0x127e   : > { %v2159_v61 = vsel %vm811_vm1, %v2155_v59, 0.0 }
0x127f   : > { %2160 = vadd.xlane.f32.xlu0 %v2159_v61 }
0x1281   : > { %2238 = vmatpush.bf16.msra.mxu3 %v2526_v38 }
0x12ea   : > { %v2158_v63 = vpop.xlane.xlu1 %2157 }
0x12eb   : > { %v2162_v0 = vmul.f32 %v2158_v63, %v2831_v19 }
0x12ed   : > { %v2164_v30 = vsub.f32 %v2154_v62, %v2162_v0 }
0x12ef   : > { %v2166_v1 = vmul.f32 %v2164_v30, %v2164_v30 }
0x12f1   : > { %v2168_v3 = vsel %vm811_vm1, %v2166_v1, 0.0 }
0x12f2   : > { %v2161_v4 = vpop.xlane.xlu0 %2160  ;;  %2169 = vadd.xlane.f32.xlu1 %v2168_v3 }
0x12f3   : > { %v2163_v48 = vmul.f32 %v2161_v4, %v2831_v19 }
0x12f5   : > { %v2165_v5 = vsub.f32 %v2155_v59, %v2163_v48 }
0x12f7   : > { %v2167_v6 = vmul.f32 %v2165_v5, %v2165_v5 }
0x12f9   : > { %v2171_v49 = vsel %vm811_vm1, %v2167_v6, 0.0 }
0x12fa   : > { %2172 = vadd.xlane.f32.xlu2 %v2171_v49 }
0x1365   : > { %v2170_v46 = vpop.xlane.xlu1 %2169 }
0x1366   : > { %v2174_v50 = vmul.f32 %v2170_v46, %v2831_v19 }
0x1368   : > { %v2176_v51 = vadd.f32 1e-06, %v2174_v50 }
0x136a   : > { %2647 = vrsqrt.f32 %v2176_v51  ;;  %vm2184_vm0 = vweird.f32 %v2176_v51 }
0x136d   : > { %v2173_v10 = vpop.xlane.xlu2 %2172 }
0x136e   : > { %v2175_v12 = vmul.f32 %v2173_v10, %v2831_v19  ;;  %v2200_v19 = vadd.f32 1.0, %v810_v18 }
0x1370   : > { %v2648_v13 = vpop.eup %2647  ;;  %v2177_v14 = vadd.f32 1e-06, %v2175_v12  ;;  %v2201_v26 = vperm.slane %v2200_v19, 1 }
0x1371   : > { %v2179_v44 = vmul.f32 %v2648_v13, %v2176_v51  ;;  %vm2185_vm15 = vweird.f32 %v2648_v13 }
0x1372   : > { %2649 = vrsqrt.f32 %v2177_v14  ;;  %vm2186_vm2 = vmor %vm2184_vm0, %vm2185_vm15  ;;  %vm2194_vm4 = vweird.f32 %v2177_v14 }
0x1373   : > { %v2180_v34 = vmul.f32 %v2648_v13, %v2179_v44 }
0x1375   : > { %v2181_v15 = vmul.f32 0.5, %v2180_v34 }
0x1377   : > { %v2182_v16 = vsub.f32 1.5, %v2181_v15 }
0x1378   : > { %v2650_v17 = vpop.eup %2649 }
0x1379   : > { %v2183_v20 = vmul.f32 %v2648_v13, %v2182_v16  ;;  %v2189_v21 = vmul.f32 %v2650_v17, %v2177_v14  ;;  %vm2195_vm3 = vweird.f32 %v2650_v17 }
0x137a   : > { %vm2196_vm5 = vmor %vm2194_vm4, %vm2195_vm3 }
0x137b   : > { %v2190_v22 = vmul.f32 %v2650_v17, %v2189_v21  ;;  %v2187_v23 = vsel %vm2186_vm2, %v2648_v13, %v2183_v20 }
0x137c   : > { %v2198_v11 = vmul.f32 %v2187_v23, %v2164_v30 }
0x137d   : > { %v2191_v24 = vmul.f32 0.5, %v2190_v22 }
0x137e   : > { %v2202_v31 = vmul.f32 %v2201_v26, %v2198_v11 }
0x137f   : > { %v2192_v25 = vsub.f32 1.5, %v2191_v24 }
0x1380   : > { %v2205_v35 = vadd.f32 %v2204_v29, %v2202_v31 }
0x1381   : > { %v2193_v27 = vmul.f32 %v2650_v17, %v2192_v25 }
0x1383   : > { %v2197_v28 = vsel %vm2196_vm5, %v2650_v17, %v2193_v27 }
0x1384   : > { %v2199_v60 = vmul.f32 %v2197_v28, %v2165_v5 }
0x1386   : > { %v2203_v33 = vmul.f32 %v2201_v26, %v2199_v60 }
0x1388   : > { %v2206_v2 = vadd.f32 %v2204_v29, %v2203_v33 }
0x138a   : > { %v2207_v36 = vpack.c.bf16 %v2206_v2, %v2205_v35 }
0x138c   : > { %2491 = vmatmul.msk.bf16.vlgmr.msra.gmra.mxu3 %vm811_vm1, %v2207_v36 }
0x140f   : > { %v2240_v39 = vpop.f32.mrf.mxu3 }
0x1410   : > { %v2241_v40 = vadd.f32 %v2556_v37, %v2240_v39 }
0x1412   : > { %2245 = vst [vmem:[%s747_s5] sm:$0xff] %v2241_v40 }
0x1417   : > { %v2242_v41 = vpop.f32.mrf.mxu3 }
0x1418   : > { %v2243_v8 = vadd.f32 %v2556_v37, %v2242_v41 }
0x141a   : > { %2246 = vst [vmem:[%s747_s5 + $0x8] sm:$0xff] %v2243_v8 }
0x141b PF: > { %s33_s4 = sadd.s32 1, %s2657_s4  }
0x141c   : > { %p30_p4 = scmp.ge.s32.totalorder %s33_s4, 4  }
0x141e   :  { %32 = sbr.rel (!%p30_p4) target bundleno = 10 (0xa), region = 148 }

</bundles_post_ra>
